<compile_context>
chip_gen: v6e
topology: v6e:2x2x1
jax: 0.10.0
libtpu: 0.0.40
codegen_flags: <defaults>
</compile_context>

<pallas_src>
import functools

import numpy as np
import jax
import jax.numpy as jnp
from jax import lax
from jax.experimental import pallas as pl
from jax.experimental.pallas import tpu as pltpu

_EPS = 1e-5  # PyTorch GroupNorm default eps


def pick_n_groups(n_channels):
    assert n_channels % 2 == 0, "n_channels must be even"
    if n_channels % 16 == 0:
        return n_channels // 16
    if n_channels % 8 == 0:
        return n_channels // 8
    if n_channels % 4 == 0:
        return n_channels // 4
    return n_channels // 2


# ----------------------------------------------------------------------------
# Trace-time constant matrices
# ----------------------------------------------------------------------------
def _group_factor_matrices(n_channels, n_groups, reduce_per_channel):
    """Factored group-mean operator: for per-channel sums s (C,1),
    Eg @ (Sg @ s) = per-channel group mean of the underlying elements."""
    cpg = n_channels // n_groups
    gid = np.arange(n_channels) // cpg
    sg = np.zeros((n_groups, n_channels), np.float32)
    sg[gid, np.arange(n_channels)] = 1.0 / float(cpg * reduce_per_channel)
    eg = (gid[:, None] == np.arange(n_groups)[None, :]).astype(np.float32)
    return jnp.asarray(sg), jnp.asarray(eg)


def _adaptive_avg_pool_matrix(h, w, k):
    # Exact AdaptiveAvgPool2d bins: [floor(i*h/k), ceil((i+1)*h/k)).
    p = np.zeros((h * w, k * k), np.float32)
    for i in range(k):
        hs, he = (i * h) // k, ((i + 1) * h + k - 1) // k
        for j in range(k):
            ws, we = (j * w) // k, ((j + 1) * w + k - 1) // k
            rows = (np.arange(hs, he)[:, None] * w + np.arange(ws, we)[None, :]).reshape(-1)
            p[rows, i * k + j] = 1.0 / float((he - hs) * (we - ws))
    return jnp.asarray(p)


# ----------------------------------------------------------------------------
# Fused per-sample kernel
# ----------------------------------------------------------------------------
def _gcu_fused_kernel(x_ref, sg1_ref, eg1_ref, g1_ref, b1_ref, pmat_ref, wb_ref,
                      sg2_ref, eg2_ref, g2_ref, b2_ref, wf_ref,
                      f_ref, gfv_ref, *,
                      beta, n_in, n_gfv, hw, kk, groups1, groups2, inv_n1, inv_n2):
    x = x_ref[0].astype(jnp.float32)                                  # (C, HW)

    def group_mean(s, sg_ref, eg_ref, groups, inv_n):
        # s: (rows, 1) per-channel sums -> per-channel group mean (broadcastable vs (rows, cols))
        if groups == 1:
            return jnp.sum(s, keepdims=True) * inv_n                   # (1, 1) scalar broadcast
        gm = jnp.dot(sg_ref[...], s, preferred_element_type=jnp.float32)      # (G, 1)
        return jnp.dot(eg_ref[...], gm, preferred_element_type=jnp.float32)   # (rows, 1)

    def swish(v):
        # x * sigmoid(beta x) written with tanh: a single EUP push + VALU (no f32 divide).
        return v * (0.5 * jnp.tanh((0.5 * beta) * v) + 0.5)

    # ---- GroupNorm 1: two-pass stats (mean, then variance of centered values) ----
    s1 = jnp.sum(x, axis=1, keepdims=True)                            # (C, 1) lane reduction
    mu1 = group_mean(s1, sg1_ref, eg1_ref, groups1, inv_n1)
    d1 = x - mu1
    v1 = group_mean(jnp.sum(d1 * d1, axis=1, keepdims=True),
                    sg1_ref, eg1_ref, groups1, inv_n1)
    xn = d1 * lax.rsqrt(v1 + _EPS) * g1_ref[...] + b1_ref[...]        # (C, HW)

    # Channels [0:C] of the fused output = xn (pre-Swish GroupNorm output, as in the module).
    f_ref[0, pl.ds(0, n_in), :] = xn.astype(f_ref.dtype)

    # TODO(synk): Dropout2d(p>0) training-mode channel masking not implemented (p=0 / eval == identity).
    f = swish(xn)

    # ---- Adaptive avg pool BEFORE the bias-free 1x1 conv (linear ops commute) ----
    pooled_f = jnp.dot(f, pmat_ref[...], preferred_element_type=jnp.float32)      # (C,  KK)
    pooled = jnp.dot(wb_ref[...], pooled_f, preferred_element_type=jnp.float32)   # (C2, KK)

    # ---- GroupNorm 2 + Swish on the tiny pooled tile ----
    t1 = jnp.sum(pooled, axis=1, keepdims=True)                        # (C2, 1)
    mu2 = group_mean(t1, sg2_ref, eg2_ref, groups2, inv_n2)
    d2 = pooled - mu2
    v2 = group_mean(jnp.sum(d2 * d2, axis=1, keepdims=True),
                    sg2_ref, eg2_ref, groups2, inv_n2)
    zn = d2 * lax.rsqrt(v2 + _EPS) * g2_ref[...] + b2_ref[...]
    zs = swish(zn)                                                     # (C2, KK)

    # ---- KxK "feature_map" conv: sum over the KK spatial taps of small (F,C2)x(C2,1) matmuls ----
    gcol = jnp.zeros((n_gfv, 1), jnp.float32)
    for t in range(kk):                                                # static unroll, kk is tiny
        gcol = gcol + jnp.dot(wf_ref[t], zs[:, t:t + 1],
                              preferred_element_type=jnp.float32)      # (F, 1)

    gfv_ref[0] = gcol.astype(gfv_ref.dtype)
    # Channels [C:C+F] of the fused output = gfv broadcast over HxW.
    f_ref[0, pl.ds(n_in, n_gfv), :] = jnp.broadcast_to(gcol, (n_gfv, hw)).astype(f_ref.dtype)


# ----------------------------------------------------------------------------
# Parameters + forward wrapper
# ----------------------------------------------------------------------------
def init_global_context_unit_params(key, in_channels, n_feature_maps, kernel_size):
    c2 = 4 * n_feature_maps
    k_b, k_f = jax.random.split(key)
    # kaiming_normal_ stand-in (fan_in, gain sqrt(2))
    wb = jax.random.normal(k_b, (c2, in_channels), jnp.float32) * np.sqrt(2.0 / in_channels)
    wf = (jax.random.normal(k_f, (n_feature_maps, c2, kernel_size, kernel_size), jnp.float32)
          * np.sqrt(2.0 / (c2 * kernel_size * kernel_size)))
    return {
        "gn1_gamma": jnp.ones((in_channels,), jnp.float32),
        "gn1_beta": jnp.zeros((in_channels,), jnp.float32),
        "bottleneck_w": wb,                      # Conv2d 1x1 weight squeezed to (4F, C)
        "gn2_gamma": jnp.ones((c2,), jnp.float32),
        "gn2_beta": jnp.zeros((c2,), jnp.float32),
        "feature_map_w": wf,                     # (F, 4F, K, K)
    }


def global_context_unit(x, params, *, kernel_size, beta=1.0):
    """Forward of GlobalContextUnit. Returns (f, gfv) like the PyTorch module."""
    b, c, h, w = x.shape
    wb = params["bottleneck_w"]
    wf = params["feature_map_w"]
    c2, nf = wb.shape[0], wf.shape[0]
    k = kernel_size
    hw, kk = h * w, k * k
    g1, g2 = pick_n_groups(c), pick_n_groups(c2)
    out_dtype = x.dtype

    x2 = x.reshape(b, c, hw)                                  # contiguous -> free reshape
    sg1, eg1 = _group_factor_matrices(c, g1, hw)              # (G1,C)/(cpg1*HW), (C,G1)
    sg2, eg2 = _group_factor_matrices(c2, g2, kk)             # (G2,C2)/(cpg2*KK), (C2,G2)
    pmat = _adaptive_avg_pool_matrix(h, w, k)                 # (HW, KK)
    gamma1 = params["gn1_gamma"].astype(jnp.float32).reshape(c, 1)
    beta1 = params["gn1_beta"].astype(jnp.float32).reshape(c, 1)
    gamma2 = params["gn2_gamma"].astype(jnp.float32).reshape(c2, 1)
    beta2 = params["gn2_beta"].astype(jnp.float32).reshape(c2, 1)
    wb_f = wb.astype(jnp.float32)
    wf_k = jnp.transpose(wf.astype(jnp.float32).reshape(nf, c2, kk), (2, 0, 1))   # (KK, F, C2)

    # Explicit VMEM budget: double-buffered x / output slabs + resident constants + temps.
    est = 4 * (2 * c * hw + 2 * (c + nf) * hw                 # pipelined per-sample slabs
               + c2 * c + hw * kk + kk * nf * c2              # weights / pool matrix
               + 2 * (g1 * c + g2 * c2) + 2 * (c + c2)        # group factors + affines
               + 3 * c * hw + 4 * c2 * kk + 2 * c * kk)       # rough in-kernel temporaries
    vmem_limit = int(min(max(est + (8 << 20), 32 << 20), 48 << 20))

    kern = functools.partial(
        _gcu_fused_kernel, beta=float(beta), n_in=c, n_gfv=nf, hw=hw, kk=kk,
        groups1=g1, groups2=g2,
        inv_n1=1.0 / float((c // g1) * hw), inv_n2=1.0 / float((c2 // g2) * kk))

    f2, gfv3 = pl.pallas_call(
        kern,
        out_shape=(jax.ShapeDtypeStruct((b, c + nf, hw), out_dtype),
                   jax.ShapeDtypeStruct((b, nf, 1), out_dtype)),
        grid_spec=pltpu.PrefetchScalarGridSpec(
            num_scalar_prefetch=0,
            grid=(b,),
            in_specs=[
                pl.BlockSpec((1, c, hw), lambda i: (i, 0, 0)),       # x (per-sample slab)
                pl.BlockSpec((g1, c), lambda i: (0, 0)),             # GN1 group-sum factor
                pl.BlockSpec((c, g1), lambda i: (0, 0)),             # GN1 broadcast-back factor
                pl.BlockSpec((c, 1), lambda i: (0, 0)),              # gamma1
                pl.BlockSpec((c, 1), lambda i: (0, 0)),              # beta1
                pl.BlockSpec((hw, kk), lambda i: (0, 0)),            # adaptive-pool matrix
                pl.BlockSpec((c2, c), lambda i: (0, 0)),             # 1x1 bottleneck weight
                pl.BlockSpec((g2, c2), lambda i: (0, 0)),            # GN2 group-sum factor
                pl.BlockSpec((c2, g2), lambda i: (0, 0)),            # GN2 broadcast-back factor
                pl.BlockSpec((c2, 1), lambda i: (0, 0)),             # gamma2
                pl.BlockSpec((c2, 1), lambda i: (0, 0)),             # beta2
                pl.BlockSpec((kk, nf, c2), lambda i: (0, 0, 0)),     # KxK conv weight (KK,F,C2)
            ],
            out_specs=[
                pl.BlockSpec((1, c + nf, hw), lambda i: (i, 0, 0)),  # concat([xn, gfv bcast])
                pl.BlockSpec((1, nf, 1), lambda i: (i, 0, 0)),       # gfv
            ],
        ),
        compiler_params=pltpu.CompilerParams(
            dimension_semantics=("parallel",),
            vmem_limit_bytes=vmem_limit),
    )(x2, sg1, eg1, gamma1, beta1, pmat, wb_f, sg2, eg2, gamma2, beta2, wf_k)

    return f2.reshape(b, c + nf, h, w), gfv3.reshape(b, nf)


# ----------------------------------------------------------------------------
# Pure-JAX reference (mirrors the PyTorch math) and self-test
# ----------------------------------------------------------------------------
def _reference_forward(x, params, *, kernel_size, beta=1.0):
    hp = lax.Precision.HIGHEST
    b, c, h, w = x.shape
    k = kernel_size
    wb, wf = params["bottleneck_w"], params["feature_map_w"]
    c2, nf = wb.shape[0], wf.shape[0]
    g1, g2 = pick_n_groups(c), pick_n_groups(c2)

    def group_norm(v, groups, gamma, bta):
        n, ch = v.shape[0], v.shape[1]
        vg = v.reshape(n, groups, -1)
        mu = vg.mean(axis=-1, keepdims=True)
        var = vg.var(axis=-1, keepdims=True)
        vn = ((vg - mu) / jnp.sqrt(var + _EPS)).reshape(v.shape)
        return vn * gamma.reshape(1, ch, 1, 1) + bta.reshape(1, ch, 1, 1)

    def swish(v):
        return v * jax.nn.sigmoid(beta * v)

    xn = group_norm(x, g1, params["gn1_gamma"], params["gn1_beta"])
    f = swish(xn)                                              # Dropout2d(p=0) == identity
    y = jnp.einsum("oc,bchw->bohw", wb, f, precision=hp)
    y = y.reshape(b, c2, k, h // k, k, w // k).mean(axis=(3, 5))   # adaptive pool (divisible case)
    z = swish(group_norm(y, g2, params["gn2_gamma"], params["gn2_beta"]))
    gfv = jnp.einsum("ockl,bckl->bo", wf, z, precision=hp)          # KxK conv -> (B, F)
    f_out = jnp.concatenate(
        [xn, jnp.broadcast_to(gfv[:, :, None, None], (b, nf, h, w))], axis=1)
    return f_out, gfv


if __name__ == "__main__":
    B, C, H, W = 2, 8, 16, 16        # batch, in_channels, spatial
    NF, K = 8, 4                     # n_feature_maps, kernel_size

    key = jax.random.PRNGKey(0)
    k_x, k_p = jax.random.split(key)
    x = jax.random.normal(k_x, (B, C, H, W), dtype=jnp.float32)
    params = init_global_context_unit_params(k_p, C, NF, K)

    fwd = jax.jit(functools.partial(global_context_unit, kernel_size=K, beta=1.0))
    f, gfv = fwd(x, params)
    jax.block_until_ready((f, gfv))

    f_ref, gfv_ref = _reference_forward(x, params, kernel_size=K, beta=1.0)
    assert f.shape == (B, C + NF, H, W) and f.dtype == x.dtype
    assert gfv.shape == (B, NF)
    assert jnp.allclose(f, f_ref, atol=2e-2, rtol=2e-2), \
        f"f mismatch, max abs err {jnp.max(jnp.abs(f - f_ref))}"
    assert jnp.allclose(gfv, gfv_ref, atol=2e-2, rtol=2e-2), \
        f"gfv mismatch, max abs err {jnp.max(jnp.abs(gfv - gfv_ref))}"
    print("KERNEL_OK")
</pallas_src>

<mosaic_0001>
module attributes {stable_mosaic.version = 11 : i64} {
  func.func @_gcu_fused_kernel(%arg0: i32, %arg1: memref<1x8x256xf32, #tpu.memory_space<vmem>>, %arg2: memref<1x8xf32, #tpu.memory_space<vmem>>, %arg3: memref<8x1xf32, #tpu.memory_space<vmem>>, %arg4: memref<8x1xf32, #tpu.memory_space<vmem>>, %arg5: memref<8x1xf32, #tpu.memory_space<vmem>>, %arg6: memref<256x16xf32, #tpu.memory_space<vmem>>, %arg7: memref<32x8xf32, #tpu.memory_space<vmem>>, %arg8: memref<2x32xf32, #tpu.memory_space<vmem>>, %arg9: memref<32x2xf32, #tpu.memory_space<vmem>>, %arg10: memref<32x1xf32, #tpu.memory_space<vmem>>, %arg11: memref<32x1xf32, #tpu.memory_space<vmem>>, %arg12: memref<16x8x32xf32, #tpu.memory_space<vmem>>, %arg13: memref<1x16x256xf32, #tpu.memory_space<vmem>>, %arg14: memref<1x8x1xf32, #tpu.memory_space<vmem>>) attributes {dimension_semantics = [#tpu.dimension_semantics<parallel>], iteration_bounds = array<i64: 2>, scalar_prefetch = 0 : i64, scratch_operands = 0 : i64, tpu.core_type = #tpu.core_type<tc>, window_params = [{transform_indices = @transform_0, window_bounds = array<i64: 1, 8, 256>}, {pipeline_mode = #tpu.pipeline_mode<synchronous>, transform_indices = @transform_1, window_bounds = array<i64: 1, 8>}, {pipeline_mode = #tpu.pipeline_mode<synchronous>, transform_indices = @transform_2, window_bounds = array<i64: 8, 1>}, {pipeline_mode = #tpu.pipeline_mode<synchronous>, transform_indices = @transform_3, window_bounds = array<i64: 8, 1>}, {pipeline_mode = #tpu.pipeline_mode<synchronous>, transform_indices = @transform_4, window_bounds = array<i64: 8, 1>}, {pipeline_mode = #tpu.pipeline_mode<synchronous>, transform_indices = @transform_5, window_bounds = array<i64: 256, 16>}, {pipeline_mode = #tpu.pipeline_mode<synchronous>, transform_indices = @transform_6, window_bounds = array<i64: 32, 8>}, {pipeline_mode = #tpu.pipeline_mode<synchronous>, transform_indices = @transform_7, window_bounds = array<i64: 2, 32>}, {pipeline_mode = #tpu.pipeline_mode<synchronous>, transform_indices = @transform_8, window_bounds = array<i64: 32, 2>}, {pipeline_mode = #tpu.pipeline_mode<synchronous>, transform_indices = @transform_9, window_bounds = array<i64: 32, 1>}, {pipeline_mode = #tpu.pipeline_mode<synchronous>, transform_indices = @transform_10, window_bounds = array<i64: 32, 1>}, {pipeline_mode = #tpu.pipeline_mode<synchronous>, transform_indices = @transform_11, window_bounds = array<i64: 16, 8, 32>}, {transform_indices = @transform_12, window_bounds = array<i64: 1, 16, 256>}, {transform_indices = @transform_13, window_bounds = array<i64: 1, 8, 1>}]} {
    %c0 = arith.constant 0 : index
    %c0_0 = arith.constant 0 : index
    %c0_1 = arith.constant 0 : index
    %0 = vector.load %arg1[%c0, %c0_0, %c0_1] : memref<1x8x256xf32, #tpu.memory_space<vmem>>, vector<1x8x256xf32>
    %1 = vector.shape_cast %0 : vector<1x8x256xf32> to vector<8x256xf32>
    %cst = arith.constant dense<0.000000e+00> : vector<8xf32>
    %2 = vector.multi_reduction <add>, %1, %cst [1] : vector<8x256xf32> to vector<8xf32>
    %3 = vector.shape_cast %2 : vector<8xf32> to vector<8x1xf32>
    %4 = vector.shape_cast %3 : vector<8x1xf32> to vector<1x8x1xf32>
    %cst_2 = arith.constant dense<0.000000e+00> : vector<1xf32>
    %5 = vector.multi_reduction <add>, %4, %cst_2 [1, 2] : vector<1x8x1xf32> to vector<1xf32>
    %6 = vector.shape_cast %5 : vector<1xf32> to vector<1x1x1xf32>
    %7 = vector.extract %6[0, 0, 0] : f32 from vector<1x1x1xf32>
    %8 = vector.broadcast %7 : f32 to vector<1x1xf32>
    %cst_3 = arith.constant 4.8828125E-4 : f32
    %9 = vector.broadcast %cst_3 : f32 to vector<1x1xf32>
    %10 = arith.mulf %8, %9 : vector<1x1xf32>
    %11 = vector.broadcast %10 : vector<1x1xf32> to vector<8x256xf32>
    %12 = arith.subf %1, %11 : vector<8x256xf32>
    %13 = arith.mulf %12, %12 : vector<8x256xf32>
    %cst_4 = arith.constant dense<0.000000e+00> : vector<8xf32>
    %14 = vector.multi_reduction <add>, %13, %cst_4 [1] : vector<8x256xf32> to vector<8xf32>
    %15 = vector.shape_cast %14 : vector<8xf32> to vector<8x1xf32>
    %16 = vector.shape_cast %15 : vector<8x1xf32> to vector<1x8x1xf32>
    %cst_5 = arith.constant dense<0.000000e+00> : vector<1xf32>
    %17 = vector.multi_reduction <add>, %16, %cst_5 [1, 2] : vector<1x8x1xf32> to vector<1xf32>
    %18 = vector.shape_cast %17 : vector<1xf32> to vector<1x1x1xf32>
    %19 = vector.extract %18[0, 0, 0] : f32 from vector<1x1x1xf32>
    %20 = vector.broadcast %19 : f32 to vector<1x1xf32>
    %cst_6 = arith.constant 4.8828125E-4 : f32
    %21 = vector.broadcast %cst_6 : f32 to vector<1x1xf32>
    %22 = arith.mulf %20, %21 : vector<1x1xf32>
    %cst_7 = arith.constant 9.99999974E-6 : f32
    %23 = vector.broadcast %cst_7 : f32 to vector<1x1xf32>
    %24 = arith.addf %22, %23 : vector<1x1xf32>
    %25 = math.rsqrt %24 : vector<1x1xf32>
    %26 = vector.broadcast %25 : vector<1x1xf32> to vector<8x256xf32>
    %27 = arith.mulf %12, %26 : vector<8x256xf32>
    %c0_8 = arith.constant 0 : index
    %c0_9 = arith.constant 0 : index
    %28 = vector.load %arg4[%c0_8, %c0_9] : memref<8x1xf32, #tpu.memory_space<vmem>>, vector<8x1xf32>
    %29 = vector.broadcast %28 : vector<8x1xf32> to vector<8x256xf32>
    %30 = arith.mulf %27, %29 : vector<8x256xf32>
    %c0_10 = arith.constant 0 : index
    %c0_11 = arith.constant 0 : index
    %31 = vector.load %arg5[%c0_10, %c0_11] : memref<8x1xf32, #tpu.memory_space<vmem>>, vector<8x1xf32>
    %32 = vector.broadcast %31 : vector<8x1xf32> to vector<8x256xf32>
    %33 = arith.addf %30, %32 : vector<8x256xf32>
    %c0_12 = arith.constant 0 : index
    %c0_13 = arith.constant 0 : index
    %c0_14 = arith.constant 0 : index
    %34 = vector.load %arg13[%c0_12, %c0_13, %c0_14] : memref<1x16x256xf32, #tpu.memory_space<vmem>>, vector<1x8x256xf32>
    %35 = vector.shape_cast %34 : vector<1x8x256xf32> to vector<8x256xf32>
    %36 = vector.shape_cast %33 : vector<8x256xf32> to vector<1x8x256xf32>
    tpu.vector_store %arg13[%c0_12, %c0_13, %c0_14], %36 {strides = array<i32>} : memref<1x16x256xf32, #tpu.memory_space<vmem>>, vector<1x8x256xf32>,
    %cst_15 = arith.constant 5.000000e-01 : f32
    %37 = vector.broadcast %cst_15 : f32 to vector<8x256xf32>
    %38 = arith.mulf %37, %33 : vector<8x256xf32>
    %39 = math.tanh %38 : vector<8x256xf32>
    %cst_16 = arith.constant 5.000000e-01 : f32
    %40 = vector.broadcast %cst_16 : f32 to vector<8x256xf32>
    %41 = arith.mulf %40, %39 : vector<8x256xf32>
    %cst_17 = arith.constant 5.000000e-01 : f32
    %42 = vector.broadcast %cst_17 : f32 to vector<8x256xf32>
    %43 = arith.addf %41, %42 : vector<8x256xf32>
    %44 = arith.mulf %33, %43 : vector<8x256xf32>
    %c0_18 = arith.constant 0 : index
    %c0_19 = arith.constant 0 : index
    %45 = vector.load %arg6[%c0_18, %c0_19] : memref<256x16xf32, #tpu.memory_space<vmem>>, vector<256x16xf32>
    %cst_20 = arith.constant dense<0.000000e+00> : vector<8x16xf32>
    %46 = tpu.matmul %44, %45, %cst_20 {dimension_numbers = #tpu.dot_dimension_numbers<[1], [0], [0], [1], [0, 0, 1, 1], [], []>} : vector<8x256xf32>, vector<256x16xf32>, vector<8x16xf32> -> vector<8x16xf32>
    %c0_21 = arith.constant 0 : index
    %c0_22 = arith.constant 0 : index
    %47 = vector.load %arg7[%c0_21, %c0_22] : memref<32x8xf32, #tpu.memory_space<vmem>>, vector<32x8xf32>
    %cst_23 = arith.constant dense<0.000000e+00> : vector<32x16xf32>
    %48 = tpu.matmul %47, %46, %cst_23 {dimension_numbers = #tpu.dot_dimension_numbers<[1], [0], [0], [1], [0, 0, 1, 1], [], []>} : vector<32x8xf32>, vector<8x16xf32>, vector<32x16xf32> -> vector<32x16xf32>
    %cst_24 = arith.constant dense<0.000000e+00> : vector<32xf32>
    %49 = vector.multi_reduction <add>, %48, %cst_24 [1] : vector<32x16xf32> to vector<32xf32>
    %50 = vector.shape_cast %49 : vector<32xf32> to vector<32x1xf32>
    %c0_25 = arith.constant 0 : index
    %c0_26 = arith.constant 0 : index
    %51 = vector.load %arg8[%c0_25, %c0_26] : memref<2x32xf32, #tpu.memory_space<vmem>>, vector<2x32xf32>
    %cst_27 = arith.constant dense<0.000000e+00> : vector<2x1xf32>
    %52 = tpu.matmul %51, %50, %cst_27 {dimension_numbers = #tpu.dot_dimension_numbers<[1], [0], [0], [1], [0, 0, 1, 1], [], []>} : vector<2x32xf32>, vector<32x1xf32>, vector<2x1xf32> -> vector<2x1xf32>
    %c0_28 = arith.constant 0 : index
    %c0_29 = arith.constant 0 : index
    %53 = vector.load %arg9[%c0_28, %c0_29] : memref<32x2xf32, #tpu.memory_space<vmem>>, vector<32x2xf32>
    %cst_30 = arith.constant dense<0.000000e+00> : vector<32x1xf32>
    %54 = tpu.matmul %53, %52, %cst_30 {dimension_numbers = #tpu.dot_dimension_numbers<[1], [0], [0], [1], [0, 0, 1, 1], [], []>} : vector<32x2xf32>, vector<2x1xf32>, vector<32x1xf32> -> vector<32x1xf32>
    %55 = vector.broadcast %54 : vector<32x1xf32> to vector<32x16xf32>
    %56 = arith.subf %48, %55 : vector<32x16xf32>
    %57 = arith.mulf %56, %56 : vector<32x16xf32>
    %cst_31 = arith.constant dense<0.000000e+00> : vector<32xf32>
    %58 = vector.multi_reduction <add>, %57, %cst_31 [1] : vector<32x16xf32> to vector<32xf32>
    %59 = vector.shape_cast %58 : vector<32xf32> to vector<32x1xf32>
    %c0_32 = arith.constant 0 : index
    %c0_33 = arith.constant 0 : index
    %60 = vector.load %arg8[%c0_32, %c0_33] : memref<2x32xf32, #tpu.memory_space<vmem>>, vector<2x32xf32>
    %cst_34 = arith.constant dense<0.000000e+00> : vector<2x1xf32>
    %61 = tpu.matmul %60, %59, %cst_34 {dimension_numbers = #tpu.dot_dimension_numbers<[1], [0], [0], [1], [0, 0, 1, 1], [], []>} : vector<2x32xf32>, vector<32x1xf32>, vector<2x1xf32> -> vector<2x1xf32>
    %c0_35 = arith.constant 0 : index
    %c0_36 = arith.constant 0 : index
    %62 = vector.load %arg9[%c0_35, %c0_36] : memref<32x2xf32, #tpu.memory_space<vmem>>, vector<32x2xf32>
    %cst_37 = arith.constant dense<0.000000e+00> : vector<32x1xf32>
    %63 = tpu.matmul %62, %61, %cst_37 {dimension_numbers = #tpu.dot_dimension_numbers<[1], [0], [0], [1], [0, 0, 1, 1], [], []>} : vector<32x2xf32>, vector<2x1xf32>, vector<32x1xf32> -> vector<32x1xf32>
    %cst_38 = arith.constant 9.99999974E-6 : f32
    %64 = vector.broadcast %cst_38 : f32 to vector<32x1xf32>
    %65 = arith.addf %63, %64 : vector<32x1xf32>
    %66 = math.rsqrt %65 : vector<32x1xf32>
    %67 = vector.broadcast %66 : vector<32x1xf32> to vector<32x16xf32>
    %68 = arith.mulf %56, %67 : vector<32x16xf32>
    %c0_39 = arith.constant 0 : index
    %c0_40 = arith.constant 0 : index
    %69 = vector.load %arg10[%c0_39, %c0_40] : memref<32x1xf32, #tpu.memory_space<vmem>>, vector<32x1xf32>
    %70 = vector.broadcast %69 : vector<32x1xf32> to vector<32x16xf32>
    %71 = arith.mulf %68, %70 : vector<32x16xf32>
    %c0_41 = arith.constant 0 : index
    %c0_42 = arith.constant 0 : index
    %72 = vector.load %arg11[%c0_41, %c0_42] : memref<32x1xf32, #tpu.memory_space<vmem>>, vector<32x1xf32>
    %73 = vector.broadcast %72 : vector<32x1xf32> to vector<32x16xf32>
    %74 = arith.addf %71, %73 : vector<32x16xf32>
    %cst_43 = arith.constant 5.000000e-01 : f32
    %75 = vector.broadcast %cst_43 : f32 to vector<32x16xf32>
    %76 = arith.mulf %75, %74 : vector<32x16xf32>
    %77 = math.tanh %76 : vector<32x16xf32>
    %cst_44 = arith.constant 5.000000e-01 : f32
    %78 = vector.broadcast %cst_44 : f32 to vector<32x16xf32>
    %79 = arith.mulf %78, %77 : vector<32x16xf32>
    %cst_45 = arith.constant 5.000000e-01 : f32
    %80 = vector.broadcast %cst_45 : f32 to vector<32x16xf32>
    %81 = arith.addf %79, %80 : vector<32x16xf32>
    %82 = arith.mulf %74, %81 : vector<32x16xf32>
    %cst_46 = arith.constant 0.000000e+00 : f32
    %83 = vector.broadcast %cst_46 : f32 to vector<8x1xf32>
    %c0_47 = arith.constant 0 : index
    %c0_48 = arith.constant 0 : index
    %c0_49 = arith.constant 0 : index
    %84 = vector.load %arg12[%c0_47, %c0_48, %c0_49] : memref<16x8x32xf32, #tpu.memory_space<vmem>>, vector<1x8x32xf32>
    %85 = vector.shape_cast %84 : vector<1x8x32xf32> to vector<8x32xf32>
    %86 = vector.extract_strided_slice %82 {offsets = [0, 0], sizes = [32, 1], strides = [1, 1]} : vector<32x16xf32> to vector<32x1xf32>
    %cst_50 = arith.constant dense<0.000000e+00> : vector<8x1xf32>
    %87 = tpu.matmul %85, %86, %cst_50 {dimension_numbers = #tpu.dot_dimension_numbers<[1], [0], [0], [1], [0, 0, 1, 1], [], []>} : vector<8x32xf32>, vector<32x1xf32>, vector<8x1xf32> -> vector<8x1xf32>
    %88 = arith.addf %83, %87 : vector<8x1xf32>
    %c1 = arith.constant 1 : index
    %c0_51 = arith.constant 0 : index
    %c0_52 = arith.constant 0 : index
    %89 = vector.load %arg12[%c1, %c0_51, %c0_52] : memref<16x8x32xf32, #tpu.memory_space<vmem>>, vector<1x8x32xf32>
    %90 = vector.shape_cast %89 : vector<1x8x32xf32> to vector<8x32xf32>
    %91 = vector.extract_strided_slice %82 {offsets = [0, 1], sizes = [32, 1], strides = [1, 1]} : vector<32x16xf32> to vector<32x1xf32>
    %cst_53 = arith.constant dense<0.000000e+00> : vector<8x1xf32>
    %92 = tpu.matmul %90, %91, %cst_53 {dimension_numbers = #tpu.dot_dimension_numbers<[1], [0], [0], [1], [0, 0, 1, 1], [], []>} : vector<8x32xf32>, vector<32x1xf32>, vector<8x1xf32> -> vector<8x1xf32>
    %93 = arith.addf %88, %92 : vector<8x1xf32>
    %c2 = arith.constant 2 : index
    %c0_54 = arith.constant 0 : index
    %c0_55 = arith.constant 0 : index
    %94 = vector.load %arg12[%c2, %c0_54, %c0_55] : memref<16x8x32xf32, #tpu.memory_space<vmem>>, vector<1x8x32xf32>
    %95 = vector.shape_cast %94 : vector<1x8x32xf32> to vector<8x32xf32>
    %96 = vector.extract_strided_slice %82 {offsets = [0, 2], sizes = [32, 1], strides = [1, 1]} : vector<32x16xf32> to vector<32x1xf32>
    %cst_56 = arith.constant dense<0.000000e+00> : vector<8x1xf32>
    %97 = tpu.matmul %95, %96, %cst_56 {dimension_numbers = #tpu.dot_dimension_numbers<[1], [0], [0], [1], [0, 0, 1, 1], [], []>} : vector<8x32xf32>, vector<32x1xf32>, vector<8x1xf32> -> vector<8x1xf32>
    %98 = arith.addf %93, %97 : vector<8x1xf32>
    %c3 = arith.constant 3 : index
    %c0_57 = arith.constant 0 : index
    %c0_58 = arith.constant 0 : index
    %99 = vector.load %arg12[%c3, %c0_57, %c0_58] : memref<16x8x32xf32, #tpu.memory_space<vmem>>, vector<1x8x32xf32>
    %100 = vector.shape_cast %99 : vector<1x8x32xf32> to vector<8x32xf32>
    %101 = vector.extract_strided_slice %82 {offsets = [0, 3], sizes = [32, 1], strides = [1, 1]} : vector<32x16xf32> to vector<32x1xf32>
    %cst_59 = arith.constant dense<0.000000e+00> : vector<8x1xf32>
    %102 = tpu.matmul %100, %101, %cst_59 {dimension_numbers = #tpu.dot_dimension_numbers<[1], [0], [0], [1], [0, 0, 1, 1], [], []>} : vector<8x32xf32>, vector<32x1xf32>, vector<8x1xf32> -> vector<8x1xf32>
    %103 = arith.addf %98, %102 : vector<8x1xf32>
    %c4 = arith.constant 4 : index
    %c0_60 = arith.constant 0 : index
    %c0_61 = arith.constant 0 : index
    %104 = vector.load %arg12[%c4, %c0_60, %c0_61] : memref<16x8x32xf32, #tpu.memory_space<vmem>>, vector<1x8x32xf32>
    %105 = vector.shape_cast %104 : vector<1x8x32xf32> to vector<8x32xf32>
    %106 = vector.extract_strided_slice %82 {offsets = [0, 4], sizes = [32, 1], strides = [1, 1]} : vector<32x16xf32> to vector<32x1xf32>
    %cst_62 = arith.constant dense<0.000000e+00> : vector<8x1xf32>
    %107 = tpu.matmul %105, %106, %cst_62 {dimension_numbers = #tpu.dot_dimension_numbers<[1], [0], [0], [1], [0, 0, 1, 1], [], []>} : vector<8x32xf32>, vector<32x1xf32>, vector<8x1xf32> -> vector<8x1xf32>
    %108 = arith.addf %103, %107 : vector<8x1xf32>
    %c5 = arith.constant 5 : index
    %c0_63 = arith.constant 0 : index
    %c0_64 = arith.constant 0 : index
    %109 = vector.load %arg12[%c5, %c0_63, %c0_64] : memref<16x8x32xf32, #tpu.memory_space<vmem>>, vector<1x8x32xf32>
    %110 = vector.shape_cast %109 : vector<1x8x32xf32> to vector<8x32xf32>
    %111 = vector.extract_strided_slice %82 {offsets = [0, 5], sizes = [32, 1], strides = [1, 1]} : vector<32x16xf32> to vector<32x1xf32>
    %cst_65 = arith.constant dense<0.000000e+00> : vector<8x1xf32>
    %112 = tpu.matmul %110, %111, %cst_65 {dimension_numbers = #tpu.dot_dimension_numbers<[1], [0], [0], [1], [0, 0, 1, 1], [], []>} : vector<8x32xf32>, vector<32x1xf32>, vector<8x1xf32> -> vector<8x1xf32>
    %113 = arith.addf %108, %112 : vector<8x1xf32>
    %c6 = arith.constant 6 : index
    %c0_66 = arith.constant 0 : index
    %c0_67 = arith.constant 0 : index
    %114 = vector.load %arg12[%c6, %c0_66, %c0_67] : memref<16x8x32xf32, #tpu.memory_space<vmem>>, vector<1x8x32xf32>
    %115 = vector.shape_cast %114 : vector<1x8x32xf32> to vector<8x32xf32>
    %116 = vector.extract_strided_slice %82 {offsets = [0, 6], sizes = [32, 1], strides = [1, 1]} : vector<32x16xf32> to vector<32x1xf32>
    %cst_68 = arith.constant dense<0.000000e+00> : vector<8x1xf32>
    %117 = tpu.matmul %115, %116, %cst_68 {dimension_numbers = #tpu.dot_dimension_numbers<[1], [0], [0], [1], [0, 0, 1, 1], [], []>} : vector<8x32xf32>, vector<32x1xf32>, vector<8x1xf32> -> vector<8x1xf32>
    %118 = arith.addf %113, %117 : vector<8x1xf32>
    %c7 = arith.constant 7 : index
    %c0_69 = arith.constant 0 : index
    %c0_70 = arith.constant 0 : index
    %119 = vector.load %arg12[%c7, %c0_69, %c0_70] : memref<16x8x32xf32, #tpu.memory_space<vmem>>, vector<1x8x32xf32>
    %120 = vector.shape_cast %119 : vector<1x8x32xf32> to vector<8x32xf32>
    %121 = vector.extract_strided_slice %82 {offsets = [0, 7], sizes = [32, 1], strides = [1, 1]} : vector<32x16xf32> to vector<32x1xf32>
    %cst_71 = arith.constant dense<0.000000e+00> : vector<8x1xf32>
    %122 = tpu.matmul %120, %121, %cst_71 {dimension_numbers = #tpu.dot_dimension_numbers<[1], [0], [0], [1], [0, 0, 1, 1], [], []>} : vector<8x32xf32>, vector<32x1xf32>, vector<8x1xf32> -> vector<8x1xf32>
    %123 = arith.addf %118, %122 : vector<8x1xf32>
    %c8 = arith.constant 8 : index
    %c0_72 = arith.constant 0 : index
    %c0_73 = arith.constant 0 : index
    %124 = vector.load %arg12[%c8, %c0_72, %c0_73] : memref<16x8x32xf32, #tpu.memory_space<vmem>>, vector<1x8x32xf32>
    %125 = vector.shape_cast %124 : vector<1x8x32xf32> to vector<8x32xf32>
    %126 = vector.extract_strided_slice %82 {offsets = [0, 8], sizes = [32, 1], strides = [1, 1]} : vector<32x16xf32> to vector<32x1xf32>
    %cst_74 = arith.constant dense<0.000000e+00> : vector<8x1xf32>
    %127 = tpu.matmul %125, %126, %cst_74 {dimension_numbers = #tpu.dot_dimension_numbers<[1], [0], [0], [1], [0, 0, 1, 1], [], []>} : vector<8x32xf32>, vector<32x1xf32>, vector<8x1xf32> -> vector<8x1xf32>
    %128 = arith.addf %123, %127 : vector<8x1xf32>
    %c9 = arith.constant 9 : index
    %c0_75 = arith.constant 0 : index
    %c0_76 = arith.constant 0 : index
    %129 = vector.load %arg12[%c9, %c0_75, %c0_76] : memref<16x8x32xf32, #tpu.memory_space<vmem>>, vector<1x8x32xf32>
    %130 = vector.shape_cast %129 : vector<1x8x32xf32> to vector<8x32xf32>
    %131 = vector.extract_strided_slice %82 {offsets = [0, 9], sizes = [32, 1], strides = [1, 1]} : vector<32x16xf32> to vector<32x1xf32>
    %cst_77 = arith.constant dense<0.000000e+00> : vector<8x1xf32>
    %132 = tpu.matmul %130, %131, %cst_77 {dimension_numbers = #tpu.dot_dimension_numbers<[1], [0], [0], [1], [0, 0, 1, 1], [], []>} : vector<8x32xf32>, vector<32x1xf32>, vector<8x1xf32> -> vector<8x1xf32>
    %133 = arith.addf %128, %132 : vector<8x1xf32>
    %c10 = arith.constant 10 : index
    %c0_78 = arith.constant 0 : index
    %c0_79 = arith.constant 0 : index
    %134 = vector.load %arg12[%c10, %c0_78, %c0_79] : memref<16x8x32xf32, #tpu.memory_space<vmem>>, vector<1x8x32xf32>
    %135 = vector.shape_cast %134 : vector<1x8x32xf32> to vector<8x32xf32>
    %136 = vector.extract_strided_slice %82 {offsets = [0, 10], sizes = [32, 1], strides = [1, 1]} : vector<32x16xf32> to vector<32x1xf32>
    %cst_80 = arith.constant dense<0.000000e+00> : vector<8x1xf32>
    %137 = tpu.matmul %135, %136, %cst_80 {dimension_numbers = #tpu.dot_dimension_numbers<[1], [0], [0], [1], [0, 0, 1, 1], [], []>} : vector<8x32xf32>, vector<32x1xf32>, vector<8x1xf32> -> vector<8x1xf32>
    %138 = arith.addf %133, %137 : vector<8x1xf32>
    %c11 = arith.constant 11 : index
    %c0_81 = arith.constant 0 : index
    %c0_82 = arith.constant 0 : index
    %139 = vector.load %arg12[%c11, %c0_81, %c0_82] : memref<16x8x32xf32, #tpu.memory_space<vmem>>, vector<1x8x32xf32>
    %140 = vector.shape_cast %139 : vector<1x8x32xf32> to vector<8x32xf32>
    %141 = vector.extract_strided_slice %82 {offsets = [0, 11], sizes = [32, 1], strides = [1, 1]} : vector<32x16xf32> to vector<32x1xf32>
    %cst_83 = arith.constant dense<0.000000e+00> : vector<8x1xf32>
    %142 = tpu.matmul %140, %141, %cst_83 {dimension_numbers = #tpu.dot_dimension_numbers<[1], [0], [0], [1], [0, 0, 1, 1], [], []>} : vector<8x32xf32>, vector<32x1xf32>, vector<8x1xf32> -> vector<8x1xf32>
    %143 = arith.addf %138, %142 : vector<8x1xf32>
    %c12 = arith.constant 12 : index
    %c0_84 = arith.constant 0 : index
    %c0_85 = arith.constant 0 : index
    %144 = vector.load %arg12[%c12, %c0_84, %c0_85] : memref<16x8x32xf32, #tpu.memory_space<vmem>>, vector<1x8x32xf32>
    %145 = vector.shape_cast %144 : vector<1x8x32xf32> to vector<8x32xf32>
    %146 = vector.extract_strided_slice %82 {offsets = [0, 12], sizes = [32, 1], strides = [1, 1]} : vector<32x16xf32> to vector<32x1xf32>
    %cst_86 = arith.constant dense<0.000000e+00> : vector<8x1xf32>
    %147 = tpu.matmul %145, %146, %cst_86 {dimension_numbers = #tpu.dot_dimension_numbers<[1], [0], [0], [1], [0, 0, 1, 1], [], []>} : vector<8x32xf32>, vector<32x1xf32>, vector<8x1xf32> -> vector<8x1xf32>
    %148 = arith.addf %143, %147 : vector<8x1xf32>
    %c13 = arith.constant 13 : index
    %c0_87 = arith.constant 0 : index
    %c0_88 = arith.constant 0 : index
    %149 = vector.load %arg12[%c13, %c0_87, %c0_88] : memref<16x8x32xf32, #tpu.memory_space<vmem>>, vector<1x8x32xf32>
    %150 = vector.shape_cast %149 : vector<1x8x32xf32> to vector<8x32xf32>
    %151 = vector.extract_strided_slice %82 {offsets = [0, 13], sizes = [32, 1], strides = [1, 1]} : vector<32x16xf32> to vector<32x1xf32>
    %cst_89 = arith.constant dense<0.000000e+00> : vector<8x1xf32>
    %152 = tpu.matmul %150, %151, %cst_89 {dimension_numbers = #tpu.dot_dimension_numbers<[1], [0], [0], [1], [0, 0, 1, 1], [], []>} : vector<8x32xf32>, vector<32x1xf32>, vector<8x1xf32> -> vector<8x1xf32>
    %153 = arith.addf %148, %152 : vector<8x1xf32>
    %c14 = arith.constant 14 : index
    %c0_90 = arith.constant 0 : index
    %c0_91 = arith.constant 0 : index
    %154 = vector.load %arg12[%c14, %c0_90, %c0_91] : memref<16x8x32xf32, #tpu.memory_space<vmem>>, vector<1x8x32xf32>
    %155 = vector.shape_cast %154 : vector<1x8x32xf32> to vector<8x32xf32>
    %156 = vector.extract_strided_slice %82 {offsets = [0, 14], sizes = [32, 1], strides = [1, 1]} : vector<32x16xf32> to vector<32x1xf32>
    %cst_92 = arith.constant dense<0.000000e+00> : vector<8x1xf32>
    %157 = tpu.matmul %155, %156, %cst_92 {dimension_numbers = #tpu.dot_dimension_numbers<[1], [0], [0], [1], [0, 0, 1, 1], [], []>} : vector<8x32xf32>, vector<32x1xf32>, vector<8x1xf32> -> vector<8x1xf32>
    %158 = arith.addf %153, %157 : vector<8x1xf32>
    %c15 = arith.constant 15 : index
    %c0_93 = arith.constant 0 : index
    %c0_94 = arith.constant 0 : index
    %159 = vector.load %arg12[%c15, %c0_93, %c0_94] : memref<16x8x32xf32, #tpu.memory_space<vmem>>, vector<1x8x32xf32>
    %160 = vector.shape_cast %159 : vector<1x8x32xf32> to vector<8x32xf32>
    %161 = vector.extract_strided_slice %82 {offsets = [0, 15], sizes = [32, 1], strides = [1, 1]} : vector<32x16xf32> to vector<32x1xf32>
    %cst_95 = arith.constant dense<0.000000e+00> : vector<8x1xf32>
    %162 = tpu.matmul %160, %161, %cst_95 {dimension_numbers = #tpu.dot_dimension_numbers<[1], [0], [0], [1], [0, 0, 1, 1], [], []>} : vector<8x32xf32>, vector<32x1xf32>, vector<8x1xf32> -> vector<8x1xf32>
    %163 = arith.addf %158, %162 : vector<8x1xf32>
    %c0_96 = arith.constant 0 : index
    %c0_97 = arith.constant 0 : index
    %c0_98 = arith.constant 0 : index
    %164 = vector.load %arg14[%c0_96, %c0_97, %c0_98] : memref<1x8x1xf32, #tpu.memory_space<vmem>>, vector<1x8x1xf32>
    %165 = vector.shape_cast %164 : vector<1x8x1xf32> to vector<8x1xf32>
    %166 = vector.shape_cast %163 : vector<8x1xf32> to vector<1x8x1xf32>
    tpu.vector_store %arg14[%c0_96, %c0_97, %c0_98], %166 {strides = array<i32>} : memref<1x8x1xf32, #tpu.memory_space<vmem>>, vector<1x8x1xf32>,
    %167 = vector.shape_cast %163 : vector<8x1xf32> to vector<8x1xf32>
    %168 = vector.broadcast %167 : vector<8x1xf32> to vector<8x256xf32>
    %c0_99 = arith.constant 0 : index
    %c8_100 = arith.constant 8 : index
    %c0_101 = arith.constant 0 : index
    %169 = vector.load %arg13[%c0_99, %c8_100, %c0_101] : memref<1x16x256xf32, #tpu.memory_space<vmem>>, vector<1x8x256xf32>
    %170 = vector.shape_cast %169 : vector<1x8x256xf32> to vector<8x256xf32>
    %171 = vector.shape_cast %168 : vector<8x256xf32> to vector<1x8x256xf32>
    tpu.vector_store %arg13[%c0_99, %c8_100, %c0_101], %171 {strides = array<i32>} : memref<1x16x256xf32, #tpu.memory_space<vmem>>, vector<1x8x256xf32>,
    return
  }
  func.func @transform_0(%arg0: i32) -> (i32, i32, i32) {
    %c0_i32 = arith.constant 0 : i32
    %c0_i32_0 = arith.constant 0 : i32
    %c0_i32_1 = arith.constant 0 : i32
    return %arg0, %c0_i32, %c0_i32_0 : i32, i32, i32
  }
  func.func @transform_1(%arg0: i32) -> (i32, i32) {
    %c0_i32 = arith.constant 0 : i32
    %c0_i32_0 = arith.constant 0 : i32
    %c0_i32_1 = arith.constant 0 : i32
    return %c0_i32, %c0_i32_0 : i32, i32
  }
  func.func @transform_2(%arg0: i32) -> (i32, i32) {
    %c0_i32 = arith.constant 0 : i32
    %c0_i32_0 = arith.constant 0 : i32
    %c0_i32_1 = arith.constant 0 : i32
    return %c0_i32, %c0_i32_0 : i32, i32
  }
  func.func @transform_3(%arg0: i32) -> (i32, i32) {
    %c0_i32 = arith.constant 0 : i32
    %c0_i32_0 = arith.constant 0 : i32
    %c0_i32_1 = arith.constant 0 : i32
    return %c0_i32, %c0_i32_0 : i32, i32
  }
  func.func @transform_4(%arg0: i32) -> (i32, i32) {
    %c0_i32 = arith.constant 0 : i32
    %c0_i32_0 = arith.constant 0 : i32
    %c0_i32_1 = arith.constant 0 : i32
    return %c0_i32, %c0_i32_0 : i32, i32
  }
  func.func @transform_5(%arg0: i32) -> (i32, i32) {
    %c0_i32 = arith.constant 0 : i32
    %c0_i32_0 = arith.constant 0 : i32
    %c0_i32_1 = arith.constant 0 : i32
    return %c0_i32, %c0_i32_0 : i32, i32
  }
  func.func @transform_6(%arg0: i32) -> (i32, i32) {
    %c0_i32 = arith.constant 0 : i32
    %c0_i32_0 = arith.constant 0 : i32
    %c0_i32_1 = arith.constant 0 : i32
    return %c0_i32, %c0_i32_0 : i32, i32
  }
  func.func @transform_7(%arg0: i32) -> (i32, i32) {
    %c0_i32 = arith.constant 0 : i32
    %c0_i32_0 = arith.constant 0 : i32
    %c0_i32_1 = arith.constant 0 : i32
    return %c0_i32, %c0_i32_0 : i32, i32
  }
  func.func @transform_8(%arg0: i32) -> (i32, i32) {
    %c0_i32 = arith.constant 0 : i32
    %c0_i32_0 = arith.constant 0 : i32
    %c0_i32_1 = arith.constant 0 : i32
    return %c0_i32, %c0_i32_0 : i32, i32
  }
  func.func @transform_9(%arg0: i32) -> (i32, i32) {
    %c0_i32 = arith.constant 0 : i32
    %c0_i32_0 = arith.constant 0 : i32
    %c0_i32_1 = arith.constant 0 : i32
    return %c0_i32, %c0_i32_0 : i32, i32
  }
  func.func @transform_10(%arg0: i32) -> (i32, i32) {
    %c0_i32 = arith.constant 0 : i32
    %c0_i32_0 = arith.constant 0 : i32
    %c0_i32_1 = arith.constant 0 : i32
    return %c0_i32, %c0_i32_0 : i32, i32
  }
  func.func @transform_11(%arg0: i32) -> (i32, i32, i32) {
    %c0_i32 = arith.constant 0 : i32
    %c0_i32_0 = arith.constant 0 : i32
    %c0_i32_1 = arith.constant 0 : i32
    %c0_i32_2 = arith.constant 0 : i32
    return %c0_i32, %c0_i32_0, %c0_i32_1 : i32, i32, i32
  }
  func.func @transform_12(%arg0: i32) -> (i32, i32, i32) {
    %c0_i32 = arith.constant 0 : i32
    %c0_i32_0 = arith.constant 0 : i32
    %c0_i32_1 = arith.constant 0 : i32
    return %arg0, %c0_i32, %c0_i32_0 : i32, i32, i32
  }
  func.func @transform_13(%arg0: i32) -> (i32, i32, i32) {
    %c0_i32 = arith.constant 0 : i32
    %c0_i32_0 = arith.constant 0 : i32
    %c0_i32_1 = arith.constant 0 : i32
    return %arg0, %c0_i32, %c0_i32_0 : i32, i32, i32
  }
}

</mosaic_0001>

<bundles_post_ra>
// kernel: global_context_unit.1
= control target key start
LH: loop header
LB: loop body
LE: loop exit
PB: predicated region body
PF: predicated region fallthrough
CT: control target
= control target key end

     0   :  { %s3285_s23 = smov 0   ;;  %s3884_s0 = inlined_call_operand.vmem [shape: f32[2,8,256], index: 0, kind: input, shape index: {}]   ;;  %s3885_s1 = inlined_call_operand.vmem [shape: f32[1,8], index: 1, kind: input, shape index: {}]   ;;  %s3886_s2 = inlined_call_operand.vmem [shape: f32[8,1], index: 2, kind: input, shape index: {}]   ;;  %s3887_s3 = inlined_call_operand.vmem [shape: f32[8,1], index: 3, kind: input, shape index: {}]   ;;  %s3888_s4 = inlined_call_operand.vmem [shape: f32[8,1], index: 4, kind: input, shape index: {}]   ;;  %s3889_s5 = inlined_call_operand.vmem [shape: f32[256,16], index: 5, kind: input, shape index: {}]   ;;  %s3890_s6 = inlined_call_operand.vmem [shape: f32[32,8], index: 6, kind: input, shape index: {}]   ;;  %s3891_s7 = inlined_call_operand.vmem [shape: f32[2,32], index: 7, kind: input, shape index: {}]   ;;  %s3892_s8 = inlined_call_operand.vmem [shape: f32[32,2], index: 8, kind: input, shape index: {}]   ;;  %s3893_s9 = inlined_call_operand.vmem [shape: f32[32,1], index: 9, kind: input, shape index: {}]   ;;  %s3894_s10 = inlined_call_operand.vmem [shape: f32[32,1], index: 10, kind: input, shape index: {}]   ;;  %s3895_s11 = inlined_call_operand.vmem [shape: f32[16,8,32], index: 11, kind: input, shape index: {}]   ;;  %s3896_s12 = inlined_call_operand.vmem [shape: f32[2,16,256], index: 12, kind: output, shape index: {0}]   ;;  %s3897_s13 = inlined_call_operand.vmem [shape: f32[2,8,1], index: 13, kind: output, shape index: {1}]  }
   0x1 LB: > { %s2712_s24 = sadd.s32 4294967295, %s3195_s23   ;;  %p2716_p0 = scmp.ge.s32.totalorder %s3195_s23, 1  ;;  %s3195_s23 = sphi %s3285_s23, %s24_s23  }
   0x2   : > { %p390_p1 = scmp.lt.s32.totalorder %s3195_s23, 3 }
   0x4   : > { %p391_p2 = pnand %p2716_p0, %p390_p1 }
   0x5   : > { %p438_p3 = scmp.lt.s32.totalorder (!%p391_p2), %s2712_s24, 1  ;;  %s3200_s18 = smov (!%p391_p2), 126  }
   0x6   : > { %394 = sbr.rel (%p391_p2) target bundleno = 3095 (0xc17), region = 68  ;;  %s3201_s19 = smov (!%p391_p2), 127  }
   0x7   : > { %s3202_s20 = smov (!%p391_p2), 124   ;;  %s3203_s21 = smov (!%p391_p2), 125  }
   0x8   : > { %s3204_s22 = smov (!%p391_p2), 122   ;;  %s3206_s26 = smov (!%p391_p2), 120  }
   0x9   : > { %s3207_s27 = smov (!%p391_p2), 121   ;;  %s3210_s14 = smov (!%p391_p2), 117  }
   0xa   : > { %s3211_s2 = smov (!%p391_p2), 116   ;;  %s3212_s16 = smov (!%p391_p2), 115  }
   0xb   : > { %s3899_s24 = smov (!%p438_p3, %s2712_s24), 1  ;;  %vm457_vm0 = vcmask 7168   ;;  %v493_v19 = vld [vmem:[%s3887_s3] sm:$0xff]  ;;  %v3197_v20 = vmov 0   ;;  %v552_v24 = vld [vmem:[%s3889_s5 + $0xf8] sm:$0xff]  ;;  %v551_v26 = vld [vmem:[%s3889_s5 + $0xf0] sm:$0xff] }
   0xc   : > { %s2771_s25 = sshll.u32 %s3899_s24, 4  ;;  %3165 = vset.pattern.permute.xlu0 %v3197_v20  ;;  %3166 = vset.pattern.permute.xlu1 %v3197_v20  ;;  %v501_v23 = vld [vmem:[%s3888_s4] sm:$0xff]  ;;  %v536_v25 = vld [vmem:[%s3889_s5 + $0x78] sm:$0xff]  ;;  %v535_v27 = vld [vmem:[%s3889_s5 + $0x70] sm:$0xff]  ;;  %s2772_s1 = sshll.u32 %s3899_s24, 5  ;;  %vm627_vm1 = vcmask 64512  }
   0xd   : > { %s442_s28 = scalar_lea.vmem %s3884_s0, %s2771_s25  ;;  %2773 = vmatprep.subr.mxu0 %v552_v24  ;;  %v550_v28 = vld [vmem:[%s3889_s5 + $0xe8] sm:$0xff]  ;;  %v549_v30 = vld [vmem:[%s3889_s5 + $0xe0] sm:$0xff]  ;;  %v548_v32 = vld [vmem:[%s3889_s5 + $0xd8] sm:$0xff]  ;;  %s3417_s15 = scalar_lea.vmem %s3896_s12, %s2772_s1  ;;  %vm725_vm2 = vcmask 130048   ;;  %vm3199_vm3 = vmmov 0   ;;  %vm739_vm4 = vcmask 261120  }
   0xe   : > { %v452_v0 = vld [vmem:[%s442_s28] sm:$0xff]  ;;  %v453_v1 = vld [vmem:[%s442_s28 + $0x8] sm:$0xff]  ;;  %2774 = vmatpush3.msra.mxu0 %v536_v25  ;;  %v532_v33 = vld [vmem:[%s3889_s5 + $0x58] sm:$0xff]  ;;  %vm817_vm5 = vcmask 15360   ;;  %vm830_vm6 = vcmask 1041408   ;;  %s3205_s25 = smov 123  }
   0xf   : > { %v454_v2 = vadd.f32 %v453_v1, %v452_v0  ;;  %2775 = vmatprep.subr.mxu0 %v551_v26  ;;  %v534_v29 = vld [vmem:[%s3889_s5 + $0x68] sm:$0xff]  ;;  %v533_v31 = vld [vmem:[%s3889_s5 + $0x60] sm:$0xff]  ;;  %v547_v34 = vld [vmem:[%s3889_s5 + $0xd0] sm:$0xff]  ;;  %s3209_s1 = smov 118   ;;  %s3213_s17 = smov 114  }
  0x10   : > { %2776 = vmatpush3.msra.mxu0 %v535_v27  ;;  %v531_v35 = vld [vmem:[%s3889_s5 + $0x50] sm:$0xff]  ;;  %v546_v36 = vld [vmem:[%s3889_s5 + $0xc8] sm:$0xff]  ;;  %v545_v38 = vld [vmem:[%s3889_s5 + $0xc0] sm:$0xff] }
  0x11   : > { %455 = vadd.xlane.f32.xlu0 %v454_v2  ;;  %2777 = vmatprep.subr.mxu0 %v550_v28  ;;  %v530_v37 = vld [vmem:[%s3889_s5 + $0x48] sm:$0xff]  ;;  %v529_v39 = vld [vmem:[%s3889_s5 + $0x40] sm:$0xff]  ;;  %v544_v40 = vld [vmem:[%s3889_s5 + $0xb8] sm:$0xff]  ;;  %v3198_v28 = vmov 0.0  }
  0x12   : > { %2778 = vmatpush3.msra.mxu0 %v534_v29  ;;  %v528_v41 = vld [vmem:[%s3889_s5 + $0x38] sm:$0xff]  ;;  %v543_v42 = vld [vmem:[%s3889_s5 + $0xb0] sm:$0xff]  ;;  %v542_v44 = vld [vmem:[%s3889_s5 + $0xa8] sm:$0xff] }
  0x13   : > { %2779 = vmatprep.subr.mxu0 %v549_v30  ;;  %v527_v43 = vld [vmem:[%s3889_s5 + $0x30] sm:$0xff]  ;;  %v526_v45 = vld [vmem:[%s3889_s5 + $0x28] sm:$0xff]  ;;  %v541_v46 = vld [vmem:[%s3889_s5 + $0xa0] sm:$0xff] }
  0x14   : > { %2780 = vmatpush3.msra.mxu0 %v533_v31  ;;  %v525_v47 = vld [vmem:[%s3889_s5 + $0x20] sm:$0xff]  ;;  %v540_v48 = vld [vmem:[%s3889_s5 + $0x98] sm:$0xff]  ;;  %v539_v50 = vld [vmem:[%s3889_s5 + $0x90] sm:$0xff] }
  0x15   : > { %2781 = vmatprep.subr.mxu0 %v548_v32  ;;  %v524_v49 = vld [vmem:[%s3889_s5 + $0x18] sm:$0xff]  ;;  %v523_v51 = vld [vmem:[%s3889_s5 + $0x10] sm:$0xff]  ;;  %v538_v52 = vld [vmem:[%s3889_s5 + $0x88] sm:$0xff] }
  0x16   : > { %2782 = vmatpush3.msra.mxu0 %v532_v33  ;;  %v522_v53 = vld [vmem:[%s3889_s5 + $0x8] sm:$0xff]  ;;  %v537_v54 = vld [vmem:[%s3889_s5 + $0x80] sm:$0xff]  ;;  %v625_v26 = vld [vmem:[%s3890_s6 + $0x10] sm:$0xff] }
  0x17   : > { %2783 = vmatprep.subr.mxu0 %v547_v34  ;;  %v521_v55 = vld [vmem:[%s3889_s5] sm:$0xff]  ;;  %v624_v25 = vld [vmem:[%s3890_s6 + $0x8] sm:$0xff]  ;;  %v626_v27 = vld [vmem:[%s3890_s6 + $0x18] sm:$0xff] }
  0x18   : > { %2784 = vmatpush3.msra.mxu0 %v531_v35 }
  0x19   : > { %2785 = vmatprep.subr.mxu0 %v546_v36 }
  0x1a   : > { %2786 = vmatpush3.msra.mxu0 %v530_v37 }
  0x1b   : > { %2787 = vmatprep.subr.mxu0 %v545_v38 }
  0x1c   : > { %2788 = vmatpush3.msra.mxu0 %v529_v39 }
  0x1d   : > { %2789 = vmatprep.subr.mxu0 %v544_v40  ;;  %v3452_v40 = vld [vmem:[%s3891_s7] sm:$0x3] }
  0x1e   : > { %2790 = vmatpush3.msra.mxu0 %v528_v41 }
  0x1f   : > { %2791 = vmatprep.subr.mxu0 %v543_v42  ;;  %v813_v42 = vld [vmem:[%s3892_s8] sm:$0xff] }
  0x20   : > { %2792 = vmatpush3.msra.mxu0 %v527_v43 }
  0x21   : > { %2793 = vmatprep.subr.mxu0 %v542_v44  ;;  %v814_v44 = vld [vmem:[%s3892_s8 + $0x8] sm:$0xff] }
  0x22   : > { %2794 = vmatpush3.msra.mxu0 %v526_v45  ;;  %v815_v45 = vld [vmem:[%s3892_s8 + $0x10] sm:$0xff] }
  0x23   : > { %2795 = vmatprep.subr.mxu0 %v541_v46 }
  0x24   : > { %2796 = vmatpush3.msra.mxu0 %v525_v47  ;;  %v816_v47 = vld [vmem:[%s3892_s8 + $0x18] sm:$0xff] }
  0x25   : > { %2797 = vmatprep.subr.mxu0 %v540_v48 }
  0x26   : > { %2798 = vmatpush3.msra.mxu0 %v524_v49 }
  0x27   : > { %2799 = vmatprep.subr.mxu0 %v539_v50 }
  0x28   : > { %2800 = vmatpush3.msra.mxu0 %v523_v51 }
  0x29   : > { %2801 = vmatprep.subr.mxu0 %v538_v52 }
  0x2a   : > { %2802 = vmatpush3.msra.mxu0 %v522_v53 }
  0x2b   : > { %2803 = vmatprep.subr.mxu0 %v537_v54 }
  0x2c   : > { %2804 = vmatpush3.msra.mxu0 %v521_v55 }
  0x2d   : > { %2970 = vmatprep.subr.mxu0 %v3198_v28 }
  0x9a   : > { %v456_v3 = vpop.xlane.xlu0 %455 }
  0x9b   : > { %v458_v4 = vsel %vm457_vm0, %v456_v3, 0.0 }
  0x9c   : > { %459 = vadd.xlane.f32.xlu0 %v458_v4 }
  0xb2   : > { %496 = vperm.xlu0 %3165, %v493_v19  }
 0x125   : > { %v460_v5 = vpop.xlane.xlu0 %459 }
 0x126   : > { %v461_v6 = vrot.slane %v460_v5, 4 }
 0x128   : > { %v462_v7 = vadd.f32 %v461_v6, %v460_v5 }
 0x12a   : > { %v463_v8 = vrot.slane %v462_v7, 2 }
 0x12c   : > { %v464_v9 = vadd.f32 %v463_v8, %v462_v7 }
 0x12d   : > { %v497_v3 = vpop.permute.xlu0 %496 }
 0x12e   : > { %v465_v10 = vrot.slane %v464_v9, 1 }
 0x130   : > { %v466_v11 = vadd.f32 %v465_v10, %v464_v9 }
 0x132   : > { %3135 = vpush %v466_v11 }
 0x163   : > { %s3136_s29 = spop %3135 }
 0x164   : > { %v468_v12 = vstv %s3136_s29 }
 0x165   : > { %v469_v13 = vmul.f32 0.00048828125, %v468_v12 }
 0x167   : > { %v3300_v14 = vsub.f32 %v452_v0, %v469_v13  ;;  %v3302_v15 = vsub.f32 %v453_v1, %v469_v13 }
 0x169   : > { %v472_v16 = vmul.f32 %v3300_v14, %v3300_v14  ;;  %v473_v17 = vmul.f32 %v3302_v15, %v3302_v15 }
 0x16b   : > { %v474_v18 = vadd.f32 %v473_v17, %v472_v16 }
 0x16d   : > { %475 = vadd.xlane.f32.xlu1 %v474_v18 }
 0x1f6   : > { %v476_v21 = vpop.xlane.xlu1 %475 }
 0x1f7   : > { %v477_v22 = vsel %vm457_vm0, %v476_v21, 0.0  ;;  %v623_v21 = vld [vmem:[%s3890_s6] sm:$0xff] }
 0x1f8   : > { %478 = vadd.xlane.f32.xlu1 %v477_v22  ;;  %2915 = vmatprep.mubr.msk.f32.mxu1 %vm627_vm1, %v623_v21 }
 0x209   : > { %504 = vperm.xlu1 %3166, %v501_v23  }
 0x281   : > { %v479_v56 = vpop.xlane.xlu1 %478 }
 0x282   : > { %v480_v57 = vrot.slane %v479_v56, 4 }
 0x284   : > { %v481_v58 = vadd.f32 %v480_v57, %v479_v56 }
 0x285   : > { %v505_v6 = vpop.permute.xlu1 %504 }
 0x286   : > { %v482_v59 = vrot.slane %v481_v58, 2 }
 0x288   : > { %v483_v60 = vadd.f32 %v482_v59, %v481_v58 }
 0x28a   : > { %v484_v61 = vrot.slane %v483_v60, 1 }
 0x28c   : > { %v485_v62 = vadd.f32 %v484_v61, %v483_v60 }
 0x28e   : > { %3137 = vpush %v485_v62 }
 0x2bf   : > { %s3138_s30 = spop %3137 }
 0x2c0   : > { %v487_v63 = vstv %s3138_s30  ;;  %s3208_s30 = smov 119  }
 0x2c1   : > { %v488_v0 = vmul.f32 0.00048828125, %v487_v63 }
 0x2c3   : > { %v489_v1 = vadd.f32 1e-05, %v488_v0 }
 0x2c5   : > { %3167 = vrsqrt.f32 %v489_v1 }
 0x2d2   : > { %v3168_v2 = vpop.eup %3167 }
 0x2d3   : > { %v491_v4 = vmul.f32 %v3168_v2, %v3300_v14  ;;  %v492_v5 = vmul.f32 %v3168_v2, %v3302_v15 }
 0x2d5   : > { %v499_v7 = vmul.f32 %v497_v3, %v491_v4  ;;  %v500_v8 = vmul.f32 %v497_v3, %v492_v5  ;;  %v1176_v4 = vld [vmem:[%s3894_s10 + $0x18] sm:$0xff] }
 0x2d6   : > { %v1148_v5 = vld [vmem:[%s3893_s9 + $0x18] sm:$0xff] }
 0x2d7   : > { %v507_v9 = vadd.f32 %v505_v6, %v499_v7  ;;  %v508_v10 = vadd.f32 %v505_v6, %v500_v8  ;;  %v1147_v6 = vld [vmem:[%s3893_s9 + $0x10] sm:$0xff] }
 0x2d9   : > { %v511_v11 = vmul.f32 0.5, %v507_v9  ;;  %v512_v12 = vmul.f32 0.5, %v508_v10  ;;  %510 = vst [vmem:[%s3417_s15 + $0x8] sm:$0xff] %v508_v10  ;;  %509 = vst [vmem:[%s3417_s15] sm:$0xff] %v507_v9 }
 0x2db   : > { %3169 = vtanh.f32 %v511_v11 }
 0x2dc   : > { %3171 = vtanh.f32 %v512_v12 }
 0x2e8   : > { %v3170_v13 = vpop.eup %3169 }
 0x2e9   : > { %v3172_v14 = vpop.eup %3171  ;;  %v515_v15 = vmul.f32 0.5, %v3170_v13 }
 0x2ea   : > { %v516_v16 = vmul.f32 0.5, %v3172_v14 }
 0x2eb   : > { %v517_v17 = vadd.f32 0.5, %v515_v15 }
 0x2ec   : > { %v518_v18 = vadd.f32 0.5, %v516_v16 }
 0x2ed   : > { %v519_v19 = vmul.f32 %v517_v17, %v507_v9 }
 0x2ee   : > { %v520_v20 = vmul.f32 %v518_v18, %v508_v10 }
 0x2f0   : > { %617 = vmatprep.mubr.f32.mxu0 %v520_v20 }
 0x2f1   : > { %618 = vmatmul.mubr.f32.vlgmr.msra.gmra.mxu0 %v519_v19 }
 0x2f2   : > { %2978 = vmatprep.mubr.msk.f32.mxu0 %vm3199_vm3, %v3198_v28 }
 0x3b1   : > { %v2805_v22 = vpop.f32.mrf.mxu0 }
 0x3b3   : > { %v2806_v23 = vpop.f32.mrf.mxu0 }
 0x3b4   : > { %v2807_v24 = vadd.f32 %v2806_v23, %v2805_v22 }
 0x3b6   : > { %2913 = vmatprep.subr.mxu1 %v2807_v24 }
 0x3b7   : > { %2914 = vmatpush3.msra.mxu1 %v2807_v24 }
 0x3b8   : > { %2916 = vmatmul.mubr.msk.f32.vlgmr.msra.gmra.mxu1 %vm627_vm1, %v624_v25  ;;  %2921 = vmatprep.subr.mxu1 %v3198_v28  ;;  %v1146_v25 = vld [vmem:[%s3893_s9 + $0x8] sm:$0xff] }
 0x3b9   : > { %2918 = vmatprep.mubr.msk.f32.mxu1 %vm627_vm1, %v625_v26  ;;  %v1175_v26 = vld [vmem:[%s3894_s10 + $0x10] sm:$0xff] }
 0x3bc   : > { %2919 = vmatmul.mubr.msk.f32.gmra.mxu1 %vm627_vm1, %v626_v27  ;;  %v1145_v27 = vld [vmem:[%s3893_s9] sm:$0xff] }
 0x3bd   : > { %2929 = vmatprep.mubr.msk.f32.mxu1 %vm3199_vm3, %v3198_v28 }
 0x478   : > { %v2917_v29 = vpop.f32.mrf.mxu1 }
 0x479   : > { %v729_v35 = vsel %vm725_vm2, %v2917_v29, 0.0 }
 0x47a   : > { %v3435_v30 = vpop.f32.mrf.mxu1 }
 0x47b   : > { %v726_v36 = vsel %vm725_vm2, %v3435_v30, 0.0 }
 0x47c   : > { %v2920_v31 = vpop.f32.mrf.mxu1 }
 0x47d   : > { %v735_v32 = vsel %vm725_vm2, %v2920_v31, 0.0 }
 0x47e   : > { %736 = vadd.xlane.f32.xlu1 %v735_v32  ;;  %v716_v33 = vpop.f32.mrf.mxu1 }
 0x47f   : > { %v732_v34 = vsel %vm725_vm2, %v716_v33, 0.0 }
 0x480   : > { %733 = vadd.xlane.f32.xlu0 %v732_v34 }
 0x482   : > { %730 = vadd.xlane.f32.xlu1 %v729_v35 }
 0x486   : > { %727 = vadd.xlane.f32.xlu1 %v726_v36 }
 0x507   : > { %v737_v37 = vpop.xlane.xlu1 %736 }
 0x508   : > { %2922 = vmatpush3.msra.mxu1 %v737_v37 }
 0x509   : > { %2923 = vmatprep.subr.mxu1 %v3198_v28  ;;  %v734_v38 = vpop.xlane.xlu0 %733 }
 0x50a   : > { %2924 = vmatpush3.msra.mxu1 %v734_v38 }
 0x50b   : > { %v731_v39 = vpop.xlane.xlu1 %730  ;;  %2925 = vmatprep.subr.mxu1 %v3198_v28 }
 0x50c   : > { %2926 = vmatpush3.msra.mxu1 %v731_v39 }
 0x50d   : > { %2927 = vmatprep.subr.mxu1 %v3198_v28 }
 0x50f   : > { %v728_v41 = vpop.xlane.xlu1 %727 }
 0x510   : > { %2928 = vmatpush3.msra.mxu1 %v728_v41 }
 0x511   : > { %2930 = vmatmul.mubr.msk.f32.vlgmr.msra.gmra.mxu1 %vm739_vm4, %v3452_v40 }
 0x512   : > { %2934 = vmatprep.mubr.msk.f32.mxu1 %vm817_vm5, %v813_v42 }
 0x5d1   : > { %v809_v43 = vpop.f32.mrf.mxu1 }
 0x5d2   : > { %2932 = vmatprep.subr.msk.mxu1 %vm830_vm6, %v809_v43 }
 0x5d3   : > { %v2931_v46 = vpop.f32.mrf.mxu1  ;;  %2933 = vmatpush3.msk.msra.mxu1 %vm830_vm6, %v809_v43 }
 0x5d4   : > { %2935 = vmatmul.mubr.msk.f32.vlgmr.msra.gmra.mxu1 %vm817_vm5, %v814_v44  ;;  %2940 = vmatprep.subr.mxu1 %v3198_v28 }
 0x5d5   : > { %2937 = vmatprep.mubr.msk.f32.mxu1 %vm817_vm5, %v815_v45 }
 0x5d8   : > { %2938 = vmatmul.mubr.msk.f32.gmra.mxu1 %vm817_vm5, %v816_v47 }
 0x5d9   : > { %2948 = vmatprep.mubr.msk.f32.mxu1 %vm3199_vm3, %v3198_v28 }
 0x694   : > { %v2936_v48 = vpop.f32.mrf.mxu1 }
 0x696   : > { %v900_v49 = vpop.f32.mrf.mxu1 }
 0x698   : > { %v2939_v50 = vpop.f32.mrf.mxu1 }
 0x699   : > { %936 = vperm.xlu1 %3166, %v2939_v50  }
 0x69a   : > { %v910_v51 = vpop.f32.mrf.mxu1 }
 0x69b   : > { %931 = vperm.xlu0 %3165, %v910_v51  }
 0x69d   : > { %926 = vperm.xlu1 %3166, %v2936_v48  }
 0x6a1   : > { %921 = vperm.xlu1 %3166, %v900_v49  }
 0x714   : > { %v937_v52 = vpop.permute.xlu1 %936 }
 0x715   : > { %v3477_v53 = vsub.f32 %v2920_v31, %v937_v52 }
 0x716   : > { %v932_v54 = vpop.permute.xlu0 %931 }
 0x717   : > { %v3479_v55 = vsub.f32 %v716_v33, %v932_v54  ;;  %v946_v56 = vmul.f32 %v3477_v53, %v3477_v53 }
 0x718   : > { %v927_v57 = vpop.permute.xlu1 %926 }
 0x719   : > { %v3483_v58 = vsub.f32 %v2917_v29, %v927_v57  ;;  %v956_v59 = vsel %vm725_vm2, %v946_v56, 0.0  ;;  %v945_v60 = vmul.f32 %v3479_v55, %v3479_v55  ;;  %v1174_v29 = vld [vmem:[%s3894_s10 + $0x8] sm:$0xff] }
 0x71a   : > { %957 = vadd.xlane.f32.xlu1 %v956_v59 }
 0x71b   : > { %v953_v61 = vsel %vm725_vm2, %v945_v60, 0.0  ;;  %v944_v62 = vmul.f32 %v3483_v58, %v3483_v58 }
 0x71c   : > { %v922_v63 = vpop.permute.xlu1 %921  ;;  %954 = vadd.xlane.f32.xlu0 %v953_v61 }
 0x71d   : > { %v3492_v0 = vsub.f32 %v3435_v30, %v922_v63  ;;  %v950_v1 = vsel %vm725_vm2, %v944_v62, 0.0  ;;  %v1173_v30 = vld [vmem:[%s3894_s10] sm:$0xff] }
 0x71e   : > { %951 = vadd.xlane.f32.xlu1 %v950_v1 }
 0x71f   : > { %v943_v2 = vmul.f32 %v3492_v0, %v3492_v0 }
 0x721   : > { %v947_v3 = vsel %vm725_vm2, %v943_v2, 0.0 }
 0x722   : > { %948 = vadd.xlane.f32.xlu1 %v947_v3 }
 0x732   : > { %1194 = vperm.xlu0 %3165, %v1176_v4  }
 0x733   : > { %1166 = vperm.xlu1 %3166, %v1148_v5  }
 0x737   : > { %1161 = vperm.xlu1 %3166, %v1147_v6  }
 0x7a3   : > { %v958_v7 = vpop.xlane.xlu1 %957 }
 0x7a4   : > { %2941 = vmatpush3.msra.mxu1 %v958_v7 }
 0x7a5   : > { %2942 = vmatprep.subr.mxu1 %v3198_v28  ;;  %v955_v8 = vpop.xlane.xlu0 %954 }
 0x7a6   : > { %2943 = vmatpush3.msra.mxu1 %v955_v8 }
 0x7a7   : > { %v952_v9 = vpop.xlane.xlu1 %951  ;;  %2944 = vmatprep.subr.mxu1 %v3198_v28 }
 0x7a8   : > { %2945 = vmatpush3.msra.mxu1 %v952_v9 }
 0x7a9   : > { %2946 = vmatprep.subr.mxu1 %v3198_v28 }
 0x7ab   : > { %v949_v10 = vpop.xlane.xlu1 %948 }
 0x7ac   : > { %2947 = vmatpush3.msra.mxu1 %v949_v10 }
 0x7ad   : > { %2949 = vmatmul.mubr.msk.f32.vlgmr.msra.gmra.mxu1 %vm739_vm4, %v3452_v40  ;;  %v1195_v32 = vpop.permute.xlu0 %1194 }
 0x7ae   : > { %2953 = vmatprep.mubr.msk.f32.mxu1 %vm817_vm5, %v813_v42 }
 0x7af   : > { %v1167_v31 = vpop.permute.xlu1 %1166 }
 0x7b3   : > { %v1162_v33 = vpop.permute.xlu1 %1161 }
 0x86d   : > { %v1025_v11 = vpop.f32.mrf.mxu1 }
 0x86e   : > { %2951 = vmatprep.subr.msk.mxu1 %vm830_vm6, %v1025_v11 }
 0x86f   : > { %v2950_v12 = vpop.f32.mrf.mxu1  ;;  %2952 = vmatpush3.msk.msra.mxu1 %vm830_vm6, %v1025_v11  ;;  %v1221_v11 = vld [vmem:[%s3895_s11] sm:$0xff] }
 0x870   : > { %2954 = vmatmul.mubr.msk.f32.vlgmr.msra.gmra.mxu1 %vm817_vm5, %v814_v44  ;;  %2959 = vmatprep.subr.mxu1 %v3198_v28 }
 0x871   : > { %2956 = vmatprep.mubr.msk.f32.mxu1 %vm817_vm5, %v815_v45 }
 0x874   : > { %2957 = vmatmul.mubr.msk.f32.gmra.mxu1 %vm817_vm5, %v816_v47 }
 0x875   : > { %2967 = vmatprep.mubr.msk.f32.mxu1 %vm3199_vm3, %v3198_v28 }
 0x930   : > { %v2955_v13 = vpop.f32.mrf.mxu1 }
 0x931   : > { %v1104_v14 = vadd.f32 1e-05, %v2955_v13 }
 0x932   : > { %v1098_v15 = vpop.f32.mrf.mxu1 }
 0x933   : > { %3173 = vrsqrt.f32 %v1104_v14  ;;  %v1099_v16 = vadd.f32 1e-05, %v1098_v15 }
 0x934   : > { %v2958_v17 = vpop.f32.mrf.mxu1 }
 0x935   : > { %3175 = vrsqrt.f32 %v1099_v16  ;;  %v1114_v18 = vadd.f32 1e-05, %v2958_v17 }
 0x936   : > { %v1108_v19 = vpop.f32.mrf.mxu1 }
 0x937   : > { %3177 = vrsqrt.f32 %v1114_v18  ;;  %v1109_v20 = vadd.f32 1e-05, %v1108_v19 }
 0x939   : > { %3179 = vrsqrt.f32 %v1109_v20 }
 0x940   : > { %v3174_v21 = vpop.eup %3173 }
 0x941   : > { %1128 = vperm.xlu0 %3165, %v3174_v21  }
 0x942   : > { %v3176_v22 = vpop.eup %3175 }
 0x943   : > { %1123 = vperm.xlu1 %3166, %v3176_v22  }
 0x944   : > { %v3178_v23 = vpop.eup %3177 }
 0x945   : > { %1138 = vperm.xlu0 %3165, %v3178_v23  }
 0x946   : > { %v3180_v24 = vpop.eup %3179 }
 0x947   : > { %1133 = vperm.xlu1 %3166, %v3180_v24  }
 0x949   : > { %1156 = vperm.xlu0 %3165, %v1146_v25  }
 0x94b   : > { %1189 = vperm.xlu1 %3166, %v1175_v26  }
 0x94d   : > { %1151 = vperm.xlu0 %3165, %v1145_v27  }
 0x94f   : > { %1184 = vperm.xlu1 %3166, %v1174_v29  }
 0x951   : > { %1179 = vperm.xlu0 %3165, %v1173_v30  }
 0x9bc   : > { %v1129_v34 = vpop.permute.xlu0 %1128 }
 0x9bd   : > { %v1142_v45 = vmul.f32 %v1129_v34, %v3483_v58 }
 0x9be   : > { %v1124_v35 = vpop.permute.xlu1 %1123 }
 0x9bf   : > { %v1141_v49 = vmul.f32 %v1124_v35, %v3492_v0 }
 0x9c0   : > { %v1139_v36 = vpop.permute.xlu0 %1138 }
 0x9c1   : > { %v1144_v37 = vmul.f32 %v1139_v36, %v3477_v53 }
 0x9c2   : > { %v1134_v38 = vpop.permute.xlu1 %1133 }
 0x9c3   : > { %v1172_v39 = vmul.f32 %v1167_v31, %v1144_v37  ;;  %v1143_v40 = vmul.f32 %v1134_v38, %v3479_v55 }
 0x9c4   : > { %v1157_v41 = vpop.permute.xlu0 %1156 }
 0x9c5   : > { %v1200_v42 = vadd.f32 %v1195_v32, %v1172_v39  ;;  %v1171_v43 = vmul.f32 %v1162_v33, %v1143_v40  ;;  %v1170_v50 = vmul.f32 %v1157_v41, %v1142_v45  ;;  %v2738_v41 = vld [vmem:[%s3895_s11 + $0x8] sm:$0xff] }
 0x9c6   : > { %v1190_v44 = vpop.permute.xlu1 %1189 }
 0x9c7   : > { %v1204_v46 = vmul.f32 0.5, %v1200_v42  ;;  %v1199_v47 = vadd.f32 %v1190_v44, %v1171_v43 }
 0x9c8   : > { %v1152_v48 = vpop.permute.xlu0 %1151 }
 0x9c9   : > { %3181 = vtanh.f32 %v1204_v46  ;;  %v1203_v51 = vmul.f32 0.5, %v1199_v47  ;;  %v1169_v53 = vmul.f32 %v1152_v48, %v1141_v49  ;;  %v2741_v48 = vld [vmem:[%s3895_s11 + $0x10] sm:$0xff]  ;;  %v2743_v49 = vld [vmem:[%s3895_s11 + $0x18] sm:$0xff] }
 0x9ca   : > { %v1185_v52 = vpop.permute.xlu1 %1184 }
 0x9cb   : > { %3183 = vtanh.f32 %v1203_v51  ;;  %v1198_v54 = vadd.f32 %v1185_v52, %v1170_v50 }
 0x9cc   : > { %v1180_v56 = vpop.permute.xlu0 %1179 }
 0x9cd   : > { %v1202_v55 = vmul.f32 0.5, %v1198_v54  ;;  %v1197_v57 = vadd.f32 %v1180_v56, %v1169_v53 }
 0x9cf   : > { %3185 = vtanh.f32 %v1202_v55  ;;  %v1201_v59 = vmul.f32 0.5, %v1197_v57 }
 0x9d1   : > { %3187 = vtanh.f32 %v1201_v59 }
 0x9d6   : > { %v3182_v60 = vpop.eup %3181 }
 0x9d7   : > { %v1212_v58 = vmul.f32 0.5, %v3182_v60 }
 0x9d8   : > { %v3184_v61 = vpop.eup %3183 }
 0x9d9   : > { %v1216_v62 = vadd.f32 0.5, %v1212_v58  ;;  %v1211_v63 = vmul.f32 0.5, %v3184_v61  ;;  %v2749_v58 = vld [vmem:[%s3895_s11 + $0x30] sm:$0xff] }
 0x9db   : > { %v3540_v1 = vmul.f32 %v1216_v62, %v1200_v42  ;;  %v1215_v0 = vadd.f32 0.5, %v1211_v63  ;;  %v2751_v63 = vld [vmem:[%s3895_s11 + $0x38] sm:$0xff] }
 0x9dc   : > { %v3186_v2 = vpop.eup %3185 }
 0x9dd   : > { %v3542_v3 = vmul.f32 %v1215_v0, %v1199_v47  ;;  %v1210_v4 = vmul.f32 0.5, %v3186_v2  ;;  %2971 = vmatpush3.msra.mxu0 %v3540_v1  ;;  %v2753_v2 = vld [vmem:[%s3895_s11 + $0x40] sm:$0xff] }
 0x9de   : > { %v3188_v5 = vpop.eup %3187  ;;  %2972 = vmatprep.subr.mxu0 %v3198_v28 }
 0x9df   : > { %v1214_v6 = vadd.f32 0.5, %v1210_v4  ;;  %v1209_v7 = vmul.f32 0.5, %v3188_v5  ;;  %2973 = vmatpush3.msra.mxu0 %v3542_v3 }
 0x9e0   : > { %2974 = vmatprep.subr.mxu0 %v3198_v28 }
 0x9e1   : > { %v3548_v8 = vmul.f32 %v1214_v6, %v1198_v54  ;;  %v1213_v9 = vadd.f32 0.5, %v1209_v7  ;;  %v2745_v54 = vld [vmem:[%s3895_s11 + $0x20] sm:$0xff]  ;;  %v2755_v6 = vld [vmem:[%s3895_s11 + $0x48] sm:$0xff] }
 0x9e3   : > { %v3550_v10 = vmul.f32 %v1213_v9, %v1197_v57  ;;  %1390 = vrot.lane.b32.xlu0 %v3548_v8, %s3200_s18  ;;  %1230 = vrot.lane.b32.xlu1 %v3548_v8, %s3201_s19  ;;  %v2747_v57 = vld [vmem:[%s3895_s11 + $0x28] sm:$0xff]  ;;  %v2757_v9 = vld [vmem:[%s3895_s11 + $0x50] sm:$0xff] }
 0x9e4   : > { %2975 = vmatpush3.msra.mxu0 %v3548_v8 }
 0x9e5   : > { %2976 = vmatprep.subr.mxu0 %v3198_v28 }
 0x9e6   : > { %2977 = vmatpush3.msra.mxu0 %v3550_v10 }
 0x9e7   : > { %1566 = vrot.lane.b32.xlu0 %v3548_v8, %s3202_s20  ;;  %1478 = vrot.lane.b32.xlu1 %v3548_v8, %s3203_s21 }
 0x9e8   : > { %2992 = vmatprep.subr.mxu0 %v3198_v28  ;;  %2979 = vmatmul.mubr.msk.f32.vlgmr.msra.gmra.mxu0 %vm739_vm4, %v1221_v11 }
 0x9e9   : > { %3000 = vmatprep.mubr.msk.f32.mxu0 %vm3199_vm3, %v3198_v28 }
 0x9eb   : > { %1742 = vrot.lane.b32.xlu0 %v3548_v8, %s3204_s22  ;;  %1654 = vrot.lane.b32.xlu1 %v3548_v8, %s3205_s25 }
 0x9ef   : > { %1918 = vrot.lane.b32.xlu0 %v3548_v8, %s3206_s26  ;;  %1830 = vrot.lane.b32.xlu1 %v3548_v8, %s3207_s27 }
 0x9f3   : > { %2006 = vrot.lane.b32.xlu1 %v3548_v8, %s3208_s30  ;;  %1228 = vrot.lane.b32.xlu0 %v3550_v10, %s3201_s19 }
 0x9f7   : > { %1234 = vrot.lane.b32.xlu1 %v3540_v1, %s3201_s19  ;;  %1388 = vrot.lane.b32.xlu0 %v3550_v10, %s3200_s18 }
 0x9fb   : > { %1394 = vrot.lane.b32.xlu1 %v3540_v1, %s3200_s18  ;;  %1476 = vrot.lane.b32.xlu0 %v3550_v10, %s3203_s21 }
 0x9ff   : > { %1482 = vrot.lane.b32.xlu1 %v3540_v1, %s3203_s21  ;;  %1564 = vrot.lane.b32.xlu0 %v3550_v10, %s3202_s20 }
 0xa03   : > { %1570 = vrot.lane.b32.xlu1 %v3540_v1, %s3202_s20  ;;  %1652 = vrot.lane.b32.xlu0 %v3550_v10, %s3205_s25 }
 0xa07   : > { %1658 = vrot.lane.b32.xlu1 %v3540_v1, %s3205_s25  ;;  %1740 = vrot.lane.b32.xlu0 %v3550_v10, %s3204_s22 }
 0xa0b   : > { %1746 = vrot.lane.b32.xlu1 %v3540_v1, %s3204_s22  ;;  %1828 = vrot.lane.b32.xlu0 %v3550_v10, %s3207_s27 }
 0xa0f   : > { %1834 = vrot.lane.b32.xlu1 %v3540_v1, %s3207_s27  ;;  %1916 = vrot.lane.b32.xlu0 %v3550_v10, %s3206_s26 }
 0xa13   : > { %1922 = vrot.lane.b32.xlu1 %v3540_v1, %s3206_s26  ;;  %2004 = vrot.lane.b32.xlu0 %v3550_v10, %s3208_s30 }
 0xa17   : > { %2010 = vrot.lane.b32.xlu1 %v3540_v1, %s3208_s30  ;;  %1232 = vrot.lane.b32.xlu0 %v3542_v3, %s3201_s19 }
 0xa1b   : > { %2098 = vrot.lane.b32.xlu1 %v3540_v1, %s3209_s1  ;;  %2094 = vrot.lane.b32.xlu0 %v3548_v8, %s3209_s1 }
 0xa1f   : > { %2186 = vrot.lane.b32.xlu1 %v3540_v1, %s3210_s14  ;;  %1392 = vrot.lane.b32.xlu0 %v3542_v3, %s3200_s18  ;;  %s3214_s18 = smov 113  }
 0xa23   : > { %1480 = vrot.lane.b32.xlu1 %v3542_v3, %s3203_s21  ;;  %2092 = vrot.lane.b32.xlu0 %v3550_v10, %s3209_s1 }
 0xa27   : > { %2182 = vrot.lane.b32.xlu1 %v3548_v8, %s3210_s14  ;;  %1568 = vrot.lane.b32.xlu0 %v3542_v3, %s3202_s20 }
 0xa2b   : > { %1656 = vrot.lane.b32.xlu1 %v3542_v3, %s3205_s25  ;;  %2180 = vrot.lane.b32.xlu0 %v3550_v10, %s3210_s14 }
 0xa2f   : > { %2274 = vrot.lane.b32.xlu1 %v3540_v1, %s3211_s2  ;;  %1744 = vrot.lane.b32.xlu0 %v3542_v3, %s3204_s22 }
 0xa33   : > { %1832 = vrot.lane.b32.xlu1 %v3542_v3, %s3207_s27  ;;  %2270 = vrot.lane.b32.xlu0 %v3548_v8, %s3211_s2 }
 0xa37   : > { %2362 = vrot.lane.b32.xlu1 %v3540_v1, %s3212_s16  ;;  %1920 = vrot.lane.b32.xlu0 %v3542_v3, %s3206_s26 }
 0xa3b   : > { %2008 = vrot.lane.b32.xlu1 %v3542_v3, %s3208_s30  ;;  %2268 = vrot.lane.b32.xlu0 %v3550_v10, %s3211_s2 }
 0xa3f   : > { %2358 = vrot.lane.b32.xlu1 %v3548_v8, %s3212_s16  ;;  %2096 = vrot.lane.b32.xlu0 %v3542_v3, %s3209_s1 }
 0xa43   : > { %2184 = vrot.lane.b32.xlu1 %v3542_v3, %s3210_s14  ;;  %2356 = vrot.lane.b32.xlu0 %v3550_v10, %s3212_s16 }
 0xa47   : > { %2450 = vrot.lane.b32.xlu1 %v3540_v1, %s3213_s17  ;;  %2272 = vrot.lane.b32.xlu0 %v3542_v3, %s3211_s2 }
 0xa4b   : > { %2360 = vrot.lane.b32.xlu1 %v3542_v3, %s3212_s16  ;;  %2446 = vrot.lane.b32.xlu0 %v3548_v8, %s3213_s17 }
 0xa4f   : > { %2538 = vrot.lane.b32.xlu1 %v3540_v1, %s3214_s18  ;;  %2448 = vrot.lane.b32.xlu0 %v3542_v3, %s3213_s17 }
 0xa53   : > { %2536 = vrot.lane.b32.xlu1 %v3542_v3, %s3214_s18  ;;  %2444 = vrot.lane.b32.xlu0 %v3550_v10, %s3213_s17  ;;  %s2721_s17 = sshll.u32 %s3899_s24, 3 }
 0xa54   : > { %s451_s20 = scalar_lea.vmem %s3897_s13, %s2721_s17 }
 0xa55   : > { %v1231_v12 = vpop.permute.xlu1 %1230  ;;  %v1391_v13 = vpop.permute.xlu0 %1390 }
 0xa57   : > { %2534 = vrot.lane.b32.xlu1 %v3548_v8, %s3214_s18  ;;  %2532 = vrot.lane.b32.xlu0 %v3550_v10, %s3214_s18 }
 0xa59   : > { %v1479_v14 = vpop.permute.xlu1 %1478  ;;  %v3658_v15 = vpop.permute.xlu0 %1566 }
 0xa5d   : > { %v3660_v16 = vpop.permute.xlu1 %1654  ;;  %v3662_v17 = vpop.permute.xlu0 %1742 }
 0xa61   : > { %v3664_v18 = vpop.permute.xlu1 %1830  ;;  %v3666_v19 = vpop.permute.xlu0 %1918 }
 0xa65   : > { %v3668_v20 = vpop.permute.xlu1 %2006  ;;  %v1229_v21 = vpop.permute.xlu0 %1228 }
 0xa69   : > { %v1235_v22 = vpop.permute.xlu1 %1234  ;;  %v1389_v23 = vpop.permute.xlu0 %1388 }
 0xa6a   : > { %2960 = vmatpush3.msra.mxu1 %v1235_v22 }
 0xa6b   : > { %2961 = vmatprep.subr.mxu1 %v3198_v28 }
 0xa6d   : > { %v1395_v24 = vpop.permute.xlu1 %1394  ;;  %v1477_v25 = vpop.permute.xlu0 %1476 }
 0xa71   : > { %v1483_v26 = vpop.permute.xlu1 %1482  ;;  %v1565_v27 = vpop.permute.xlu0 %1564 }
 0xa72   : > { %2993 = vmatpush3.msra.mxu0 %v1483_v26 }
 0xa73   : > { %2994 = vmatprep.subr.mxu0 %v3198_v28 }
 0xa75   : > { %v1571_v29 = vpop.permute.xlu1 %1570  ;;  %v3672_v30 = vpop.permute.xlu0 %1652 }
 0xa79   : > { %v1659_v31 = vpop.permute.xlu1 %1658  ;;  %v3674_v32 = vpop.permute.xlu0 %1740 }
 0xa7d   : > { %v1747_v33 = vpop.permute.xlu1 %1746  ;;  %v3676_v34 = vpop.permute.xlu0 %1828 }
 0xa81   : > { %v3678_v35 = vpop.permute.xlu1 %1834  ;;  %v3680_v36 = vpop.permute.xlu0 %1916 }
 0xa85   : > { %v3682_v37 = vpop.permute.xlu1 %1922  ;;  %v3684_v38 = vpop.permute.xlu0 %2004 }
 0xa89   : > { %v3686_v39 = vpop.permute.xlu1 %2010  ;;  %v1233_v40 = vpop.permute.xlu0 %1232 }
 0xa8a   : > { %2962 = vmatpush3.msra.mxu1 %v1233_v40 }
 0xa8b   : > { %2963 = vmatprep.subr.mxu1 %v3198_v28 }
 0xa8c   : > { %2964 = vmatpush3.msra.mxu1 %v1231_v12  ;;  %v2759_v12 = vld [vmem:[%s3895_s11 + $0x58] sm:$0xff] }
 0xa8d   : > { %v3692_v42 = vpop.permute.xlu1 %2098  ;;  %2965 = vmatprep.subr.mxu1 %v3198_v28  ;;  %v3695_v43 = vpop.permute.xlu0 %2094 }
 0xa8e   : > { %2966 = vmatpush3.msra.mxu1 %v1229_v21 }
 0xa8f   : > { %2981 = vmatprep.subr.mxu1 %v3198_v28  ;;  %2968 = vmatmul.mubr.msk.f32.vlgmr.msra.gmra.mxu1 %vm739_vm4, %v2738_v41 }
 0xa90   : > { %2982 = vmatpush3.msra.mxu1 %v1395_v24  ;;  %2989 = vmatprep.mubr.msk.f32.mxu1 %vm3199_vm3, %v3198_v28  ;;  %v2767_v24 = vld [vmem:[%s3895_s11 + $0x78] sm:$0xff] }
 0xa91   : > { %v3701_v44 = vpop.permute.xlu1 %2186  ;;  %2983 = vmatprep.subr.mxu1 %v3198_v28  ;;  %v1393_v45 = vpop.permute.xlu0 %1392 }
 0xa92   : > { %2984 = vmatpush3.msra.mxu1 %v1393_v45 }
 0xa93   : > { %2985 = vmatprep.subr.mxu1 %v3198_v28 }
 0xa94   : > { %2986 = vmatpush3.msra.mxu1 %v1391_v13 }
 0xa95   : > { %v1481_v46 = vpop.permute.xlu1 %1480  ;;  %2987 = vmatprep.subr.mxu1 %v3198_v28  ;;  %v3706_v47 = vpop.permute.xlu0 %2092 }
 0xa96   : > { %2988 = vmatpush3.msra.mxu1 %v1389_v23  ;;  %2995 = vmatpush3.msra.mxu0 %v1481_v46 }
 0xa97   : > { %2996 = vmatprep.subr.mxu0 %v3198_v28  ;;  %3003 = vmatprep.subr.mxu1 %v3198_v28 }
 0xa98   : > { %2990 = vmatmul.mubr.msk.f32.vlgmr.msra.gmra.mxu1 %vm739_vm4, %v2741_v48  ;;  %2997 = vmatpush3.msra.mxu0 %v1479_v14  ;;  %v2761_v14 = vld [vmem:[%s3895_s11 + $0x60] sm:$0xff] }
 0xa99   : > { %3004 = vmatpush3.msra.mxu1 %v1571_v29  ;;  %v3717_v50 = vpop.permute.xlu1 %2182  ;;  %2998 = vmatprep.subr.mxu0 %v3198_v28  ;;  %v1569_v51 = vpop.permute.xlu0 %1568 }
 0xa9a   : > { %3005 = vmatprep.subr.mxu1 %v3198_v28  ;;  %2999 = vmatpush3.msra.mxu0 %v1477_v25 }
 0xa9b   : > { %3006 = vmatpush3.msra.mxu1 %v1569_v51  ;;  %3001 = vmatmul.mubr.msk.f32.vlgmr.msra.gmra.mxu0 %vm739_vm4, %v2743_v49 }
 0xa9c   : > { %3007 = vmatprep.subr.mxu1 %v3198_v28  ;;  %3014 = vmatprep.subr.mxu0 %v3198_v28 }
 0xa9d   : > { %3008 = vmatpush3.msra.mxu1 %v3658_v15  ;;  %3015 = vmatpush3.msra.mxu0 %v1659_v31  ;;  %v1657_v52 = vpop.permute.xlu1 %1656  ;;  %v3725_v53 = vpop.permute.xlu0 %2180 }
 0xa9e   : > { %3009 = vmatprep.subr.mxu1 %v3198_v28  ;;  %3016 = vmatprep.subr.mxu0 %v3198_v28 }
 0xa9f   : > { %3010 = vmatpush3.msra.mxu1 %v1565_v27  ;;  %3011 = vmatprep.mubr.msk.f32.mxu1 %vm3199_vm3, %v3198_v28 }
 0xaa0   : > { %3017 = vmatpush3.msra.mxu0 %v1657_v52  ;;  %3012 = vmatmul.mubr.msk.f32.vlgmr.msra.gmra.mxu1 %vm739_vm4, %v2745_v54 }
 0xaa1   : > { %3018 = vmatprep.subr.mxu0 %v3198_v28  ;;  %3025 = vmatprep.subr.mxu1 %v3198_v28  ;;  %v3737_v56 = vpop.permute.xlu1 %2274  ;;  %v1745_v55 = vpop.permute.xlu0 %1744 }
 0xaa2   : > { %3019 = vmatpush3.msra.mxu0 %v3660_v16  ;;  %3026 = vmatpush3.msra.mxu1 %v1747_v33 }
 0xaa3   : > { %3020 = vmatprep.subr.mxu0 %v3198_v28  ;;  %3027 = vmatprep.subr.mxu1 %v3198_v28 }
 0xaa4   : > { %3021 = vmatpush3.msra.mxu0 %v3672_v30  ;;  %3022 = vmatprep.mubr.msk.f32.mxu0 %vm3199_vm3, %v3198_v28 }
 0xaa5   : > { %3028 = vmatpush3.msra.mxu1 %v1745_v55  ;;  %3023 = vmatmul.mubr.msk.f32.vlgmr.msra.gmra.mxu0 %vm739_vm4, %v2747_v57  ;;  %v1833_v59 = vpop.permute.xlu1 %1832  ;;  %v3749_v60 = vpop.permute.xlu0 %2270 }
 0xaa6   : > { %3029 = vmatprep.subr.mxu1 %v3198_v28  ;;  %3036 = vmatprep.subr.mxu0 %v3198_v28 }
 0xaa7   : > { %3030 = vmatpush3.msra.mxu1 %v3662_v17  ;;  %3037 = vmatpush3.msra.mxu0 %v3678_v35  ;;  %v2763_v17 = vld [vmem:[%s3895_s11 + $0x68] sm:$0xff] }
 0xaa8   : > { %3031 = vmatprep.subr.mxu1 %v3198_v28  ;;  %3038 = vmatprep.subr.mxu0 %v3198_v28  ;;  %v1382_v22 = vpop.f32.mrf.mxu0 }
 0xaa9   : > { %3032 = vmatpush3.msra.mxu1 %v3674_v32  ;;  %3033 = vmatprep.mubr.msk.f32.mxu1 %vm3199_vm3, %v3198_v28  ;;  %v3763_v61 = vpop.permute.xlu1 %2362  ;;  %v1921_v62 = vpop.permute.xlu0 %1920 }
 0xaaa   : > { %3039 = vmatpush3.msra.mxu0 %v1833_v59  ;;  %3034 = vmatmul.mubr.msk.f32.vlgmr.msra.gmra.mxu1 %vm739_vm4, %v2749_v58  ;;  %v2980_v23 = vpop.f32.mrf.mxu0 }
 0xaab   : > { %3040 = vmatprep.subr.mxu0 %v3198_v28  ;;  %3047 = vmatprep.subr.mxu1 %v3198_v28 }
 0xaac   : > { %3041 = vmatpush3.msra.mxu0 %v3664_v18  ;;  %3048 = vmatpush3.msra.mxu1 %v3682_v37 }
 0xaad   : > { %3042 = vmatprep.subr.mxu0 %v3198_v28  ;;  %3049 = vmatprep.subr.mxu1 %v3198_v28  ;;  %v2009_v1 = vpop.permute.xlu1 %2008  ;;  %v3775_v0 = vpop.permute.xlu0 %2268 }
 0xaae   : > { %3043 = vmatpush3.msra.mxu0 %v3676_v34  ;;  %3044 = vmatprep.mubr.msk.f32.mxu0 %vm3199_vm3, %v3198_v28 }
 0xaaf   : > { %3050 = vmatpush3.msra.mxu1 %v1921_v62  ;;  %3045 = vmatmul.mubr.msk.f32.vlgmr.msra.gmra.mxu0 %vm739_vm4, %v2751_v63 }
 0xab0   : > { %3051 = vmatprep.subr.mxu1 %v3198_v28  ;;  %3058 = vmatprep.subr.mxu0 %v3198_v28 }
 0xab1   : > { %3052 = vmatpush3.msra.mxu1 %v3666_v19  ;;  %3059 = vmatpush3.msra.mxu0 %v3686_v39  ;;  %v2359_v3 = vpop.permute.xlu1 %2358  ;;  %v2097_v4 = vpop.permute.xlu0 %2096 }
 0xab2   : > { %3053 = vmatprep.subr.mxu1 %v3198_v28  ;;  %3060 = vmatprep.subr.mxu0 %v3198_v28 }
 0xab3   : > { %3054 = vmatpush3.msra.mxu1 %v3680_v36  ;;  %3055 = vmatprep.mubr.msk.f32.mxu1 %vm3199_vm3, %v3198_v28 }
 0xab4   : > { %3061 = vmatpush3.msra.mxu0 %v2009_v1  ;;  %3056 = vmatmul.mubr.msk.f32.vlgmr.msra.gmra.mxu1 %vm739_vm4, %v2753_v2 }
 0xab5   : > { %3062 = vmatprep.subr.mxu0 %v3198_v28  ;;  %3069 = vmatprep.subr.mxu1 %v3198_v28  ;;  %v2185_v5 = vpop.permute.xlu1 %2184  ;;  %v2357_v7 = vpop.permute.xlu0 %2356 }
 0xab6   : > { %3063 = vmatpush3.msra.mxu0 %v3668_v20  ;;  %3070 = vmatpush3.msra.mxu1 %v3692_v42  ;;  %v2765_v20 = vld [vmem:[%s3895_s11 + $0x70] sm:$0xff] }
 0xab7   : > { %3064 = vmatprep.subr.mxu0 %v3198_v28  ;;  %3071 = vmatprep.subr.mxu1 %v3198_v28 }
 0xab8   : > { %3065 = vmatpush3.msra.mxu0 %v3684_v38  ;;  %3066 = vmatprep.mubr.msk.f32.mxu0 %vm3199_vm3, %v3198_v28 }
 0xab9   : > { %3072 = vmatpush3.msra.mxu1 %v2097_v4  ;;  %3067 = vmatmul.mubr.msk.f32.vlgmr.msra.gmra.mxu0 %vm739_vm4, %v2755_v6  ;;  %v2451_v8 = vpop.permute.xlu1 %2450  ;;  %v2273_v10 = vpop.permute.xlu0 %2272 }
 0xaba   : > { %3073 = vmatprep.subr.mxu1 %v3198_v28  ;;  %3080 = vmatprep.subr.mxu0 %v3198_v28 }
 0xabb   : > { %3074 = vmatpush3.msra.mxu1 %v3695_v43  ;;  %3081 = vmatpush3.msra.mxu0 %v3701_v44 }
 0xabc   : > { %3075 = vmatprep.subr.mxu1 %v3198_v28  ;;  %3082 = vmatprep.subr.mxu0 %v3198_v28 }
 0xabd   : > { %3076 = vmatpush3.msra.mxu1 %v3706_v47  ;;  %3077 = vmatprep.mubr.msk.f32.mxu1 %vm3199_vm3, %v3198_v28  ;;  %v2361_v11 = vpop.permute.xlu1 %2360  ;;  %v2447_v13 = vpop.permute.xlu0 %2446 }
 0xabe   : > { %3083 = vmatpush3.msra.mxu0 %v2185_v5  ;;  %3078 = vmatmul.mubr.msk.f32.vlgmr.msra.gmra.mxu1 %vm739_vm4, %v2757_v9 }
 0xabf   : > { %3084 = vmatprep.subr.mxu0 %v3198_v28  ;;  %3091 = vmatprep.subr.mxu1 %v3198_v28 }
 0xac0   : > { %3085 = vmatpush3.msra.mxu0 %v3717_v50  ;;  %3092 = vmatpush3.msra.mxu1 %v3737_v56 }
 0xac1   : > { %3086 = vmatprep.subr.mxu0 %v3198_v28  ;;  %3093 = vmatprep.subr.mxu1 %v3198_v28  ;;  %v2539_v15 = vpop.permute.xlu1 %2538  ;;  %v2449_v16 = vpop.permute.xlu0 %2448 }
 0xac2   : > { %3087 = vmatpush3.msra.mxu0 %v3725_v53  ;;  %3088 = vmatprep.mubr.msk.f32.mxu0 %vm3199_vm3, %v3198_v28 }
 0xac3   : > { %3094 = vmatpush3.msra.mxu1 %v2273_v10  ;;  %3089 = vmatmul.mubr.msk.f32.vlgmr.msra.gmra.mxu0 %vm739_vm4, %v2759_v12 }
 0xac4   : > { %3095 = vmatprep.subr.mxu1 %v3198_v28  ;;  %3102 = vmatprep.subr.mxu0 %v3198_v28 }
 0xac5   : > { %3096 = vmatpush3.msra.mxu1 %v3749_v60  ;;  %3103 = vmatpush3.msra.mxu0 %v3763_v61  ;;  %v2537_v18 = vpop.permute.xlu1 %2536  ;;  %v2445_v19 = vpop.permute.xlu0 %2444 }
 0xac6   : > { %3097 = vmatprep.subr.mxu1 %v3198_v28  ;;  %3104 = vmatprep.subr.mxu0 %v3198_v28 }
 0xac7   : > { %3098 = vmatpush3.msra.mxu1 %v3775_v0  ;;  %3099 = vmatprep.mubr.msk.f32.mxu1 %vm3199_vm3, %v3198_v28 }
 0xac8   : > { %3105 = vmatpush3.msra.mxu0 %v2361_v11  ;;  %3100 = vmatmul.mubr.msk.f32.vlgmr.msra.gmra.mxu1 %vm739_vm4, %v2761_v14 }
 0xac9   : > { %3106 = vmatprep.subr.mxu0 %v3198_v28  ;;  %3113 = vmatprep.subr.mxu1 %v3198_v28  ;;  %v2535_v21 = vpop.permute.xlu1 %2534  ;;  %v2533_v25 = vpop.permute.xlu0 %2532 }
 0xaca   : > { %3107 = vmatpush3.msra.mxu0 %v2359_v3  ;;  %3114 = vmatpush3.msra.mxu1 %v2451_v8 }
 0xacb   : > { %3108 = vmatprep.subr.mxu0 %v3198_v28  ;;  %3115 = vmatprep.subr.mxu1 %v3198_v28 }
 0xacc   : > { %3109 = vmatpush3.msra.mxu0 %v2357_v7  ;;  %3110 = vmatprep.mubr.msk.f32.mxu0 %vm3199_vm3, %v3198_v28 }
 0xacd   : > { %3116 = vmatpush3.msra.mxu1 %v2449_v16  ;;  %3111 = vmatmul.mubr.msk.f32.vlgmr.msra.gmra.mxu0 %vm739_vm4, %v2763_v17 }
 0xace   : > { %3117 = vmatprep.subr.mxu1 %v3198_v28  ;;  %3124 = vmatprep.subr.mxu0 %v3198_v28 }
 0xacf   : > { %3118 = vmatpush3.msra.mxu1 %v2447_v13  ;;  %3125 = vmatpush3.msra.mxu0 %v2539_v15 }
 0xad0   : > { %3119 = vmatprep.subr.mxu1 %v3198_v28  ;;  %3126 = vmatprep.subr.mxu0 %v3198_v28 }
 0xad1   : > { %3120 = vmatpush3.msra.mxu1 %v2445_v19  ;;  %3121 = vmatprep.mubr.msk.f32.mxu1 %vm3199_vm3, %v3198_v28 }
 0xad2   : > { %3127 = vmatpush3.msra.mxu0 %v2537_v18  ;;  %3122 = vmatmul.mubr.msk.f32.vlgmr.msra.gmra.mxu1 %vm739_vm4, %v2765_v20 }
 0xad3   : > { %3128 = vmatprep.subr.mxu0 %v3198_v28  ;;  %3132 = vmatprep.mubr.msk.f32.mxu0 %vm3199_vm3, %v3198_v28 }
 0xad4   : > { %3129 = vmatpush3.msra.mxu0 %v2535_v21 }
 0xad5   : > { %3130 = vmatprep.subr.mxu0 %v3198_v28 }
 0xad6   : > { %3131 = vmatpush3.msra.mxu0 %v2533_v25 }
 0xad7   : > { %3133 = vmatmul.mubr.msk.f32.vlgmr.msra.gmra.mxu0 %vm739_vm4, %v2767_v24 }
 0xb4f   : > { %v1309_v26 = vpop.f32.mrf.mxu1 }
 0xb50   : > { %v1383_v43 = vadd.f32 %v1382_v22, %v1309_v26 }
 0xb51   : > { %v2969_v27 = vpop.f32.mrf.mxu1 }
 0xb58   : > { %v1469_v29 = vpop.f32.mrf.mxu1 }
 0xb59   : > { %v1473_v45 = vadd.f32 %v1469_v29, %v1383_v43 }
 0xb5a   : > { %v2991_v30 = vpop.f32.mrf.mxu1 }
 0xb5b   : > { %v1557_v31 = vpop.f32.mrf.mxu0 }
 0xb5c   : > { %v1561_v47 = vadd.f32 %v1557_v31, %v1473_v45 }
 0xb5d   : > { %v3002_v32 = vpop.f32.mrf.mxu0 }
 0xb60   : > { %v1645_v33 = vpop.f32.mrf.mxu1 }
 0xb61   : > { %v1649_v49 = vadd.f32 %v1645_v33, %v1561_v47 }
 0xb62   : > { %v3013_v34 = vpop.f32.mrf.mxu1 }
 0xb65   : > { %v1733_v35 = vpop.f32.mrf.mxu0 }
 0xb66   : > { %v1737_v51 = vadd.f32 %v1733_v35, %v1649_v49 }
 0xb67   : > { %v3024_v36 = vpop.f32.mrf.mxu0 }
 0xb6a   : > { %v1821_v37 = vpop.f32.mrf.mxu1 }
 0xb6b   : > { %v1825_v53 = vadd.f32 %v1821_v37, %v1737_v51 }
 0xb6c   : > { %v3035_v38 = vpop.f32.mrf.mxu1 }
 0xb6f   : > { %v1909_v39 = vpop.f32.mrf.mxu0 }
 0xb70   : > { %v1913_v54 = vadd.f32 %v1909_v39, %v1825_v53 }
 0xb71   : > { %v3046_v40 = vpop.f32.mrf.mxu0 }
 0xb74   : > { %v1997_v41 = vpop.f32.mrf.mxu1 }
 0xb75   : > { %v2001_v55 = vadd.f32 %v1997_v41, %v1913_v54 }
 0xb76   : > { %v3057_v42 = vpop.f32.mrf.mxu1 }
 0xb79   : > { %v2085_v28 = vpop.f32.mrf.mxu0 }
 0xb7a   : > { %v2089_v59 = vadd.f32 %v2085_v28, %v2001_v55 }
 0xb7b   : > { %v3068_v44 = vpop.f32.mrf.mxu0 }
 0xb7e   : > { %v2173_v46 = vpop.f32.mrf.mxu1 }
 0xb7f   : > { %v2177_v58 = vadd.f32 %v2173_v46, %v2089_v59 }
 0xb80   : > { %v3079_v48 = vpop.f32.mrf.mxu1 }
 0xb83   : > { %v2261_v50 = vpop.f32.mrf.mxu0 }
 0xb84   : > { %v2265_v62 = vadd.f32 %v2261_v50, %v2177_v58 }
 0xb85   : > { %v3090_v52 = vpop.f32.mrf.mxu0 }
 0xb88   : > { %v2349_v56 = vpop.f32.mrf.mxu1 }
 0xb89   : > { %v2353_v63 = vadd.f32 %v2349_v56, %v2265_v62 }
 0xb8a   : > { %v3101_v57 = vpop.f32.mrf.mxu1 }
 0xb8d   : > { %v2437_v60 = vpop.f32.mrf.mxu0 }
 0xb8e   : > { %v2441_v0 = vadd.f32 %v2437_v60, %v2353_v63 }
 0xb8f   : > { %v3112_v61 = vpop.f32.mrf.mxu0 }
 0xb92   : > { %v2525_v1 = vpop.f32.mrf.mxu1 }
 0xb93   : > { %v2529_v3 = vadd.f32 %v2525_v1, %v2441_v0 }
 0xb94   : > { %v3123_v2 = vpop.f32.mrf.mxu1 }
 0xb97   : > { %v2613_v4 = vpop.f32.mrf.mxu0 }
 0xb98   : > { %v2617_v5 = vadd.f32 %v2613_v4, %v2529_v3 }
 0xb99   : > { %v3134_v6 = vpop.f32.mrf.mxu0 }
 0xb9a   : > { %2618 = vst.msk [vmem:[%s451_s20] sm:$0xff] %vm457_vm0, %v2617_v5  ;;  %2621 = vperm.xlu1 %3166, %v2617_v5  }
 0xc15   : > { %v2622_v7 = vpop.permute.xlu1 %2621 }
 0xc16   : > { %2624 = vst [vmem:[%s3417_s15 + $0x10] sm:$0xff] %v2622_v7  ;;  %2625 = vst [vmem:[%s3417_s15 + $0x18] sm:$0xff] %v2622_v7 }
 0xc17 PF: > { %s24_s23 = sadd.s32 1, %s3195_s23  }
 0xc18   : > { %p21_p4 = scmp.ge.s32.totalorder %s24_s23, 4  }
 0xc1a   :  { %23 = sbr.rel (!%p21_p4) target bundleno = 1 (0x1), region = 125 }

</bundles_post_ra>
